<compile_context>
chip_gen: v7x
topology: tpu7x:2x2x1
jax: 0.10.0
libtpu: 0.0.40
codegen_flags: <defaults>
</compile_context>

<pallas_src>
import functools

import jax
import jax.numpy as jnp
from jax.experimental import pallas as pl
from jax.experimental.pallas import tpu as pltpu


_K_TILE_MAX = 8                  # max L slices per grid step
_L_TILE_BYTES = 2 << 20          # budget for one L block
_KRON_MAX_BYTES = 4 << 20        # max size of the materialized kron(Wi_k, L_k)
_PATHA_CC_MAX = 128              # fused-kron path only for small channel counts
_PATHA_KCC_MAX = 256             # cap on unrolled kron-build statements / step
_SMEM_WI_MAX_BYTES = 128 << 10   # Wi scalars kept in SMEM on the fused path
_X_BLOCK_TARGET_BYTES = 4 << 20  # soft target for one activation block


def _vmem_capacity_bytes():
    # Generation-aware VMEM budget (64 MiB/TC on v7x, 128 MiB on v5e/v6e).
    try:
        return int(pltpu.get_tpu_info().vmem_capacity_bytes)
    except Exception:
        return 64 << 20            # conservative fallback (v7x-sized)


def _row_align(*dtypes):
    # Sub-32-bit dtypes pack 2-4 rows per sublane: round the batch tile to
    # 8 (f32) / 16 (bf16) / 32 (int8) rows.
    return max(max(8, 32 // jnp.dtype(dt).itemsize) for dt in dtypes)


def _pick_k_tile(num_L, d, csize, cc, fused_path):
    best = 1
    for t in range(1, min(num_L, _K_TILE_MAX) + 1):
        if num_L % t:
            continue
        if t * d * d * csize > _L_TILE_BYTES:
            continue
        if fused_path and t * cc > _PATHA_KCC_MAX:
            continue
        best = t
    return best


def _pick_tb(b, row_bytes, fixed_bytes, budget, row_align, target_rows):
    """Largest batch tile that fits the VMEM budget (shrink the tile, never
    clamp the limit); guarantees nb >= 2 when b permits (two v7x TCs)."""
    if b <= row_align:
        return b
    avail = max(0, budget - fixed_bytes)
    tb = min(b, target_rows, max(row_align, avail // max(1, row_bytes)))
    if tb >= b and b >= 2 * row_align:
        tb = (b + 1) // 2            # make the parallel batch axis span 2 cores
    tb = max(row_align, (tb // row_align) * row_align)
    return min(tb, b)


# --------------------------------------------------------------------------
# kernels
# --------------------------------------------------------------------------

def _make_kernel_fused(d, cin, cout, k_tile, n_kb, compute_dtype, use_scratch):
    """Fused-kron path: native (b, cin*d) layout, one matmul per L slice."""
    f32 = jnp.float32
    cc = cout * cin

    def kernel(L_ref, Wi_ref, x_ref, o_ref, kron_ref, *rest):
        # The output block's index_map ignores the k grid axis, so it stays
        # resident across the whole reduction (accumulator).  Keep that grid
        # axis "arbitrary" -- do NOT mark it "parallel".
        acc_ref = rest[0] if use_scratch else o_ref
        kb = pl.program_id(1)

        x_blk = x_ref[...]                                  # (tb, cin*d)
        x_cd = (x_blk if x_blk.dtype == compute_dtype
                else x_blk.astype(compute_dtype))           # cast hoisted, once

        for kk in range(k_tile):
            Lk = L_ref[kk]                                  # (d, d) compute dtype
            base = (kb * k_tile + kk) * cc
            # Build kron(Wi[k], L[k]) into VMEM: cout*cin scalar-broadcast
            # multiplies of the (d,d) L slice (VPU; tiny vs. the matmul).
            for o in range(cout):
                rows = pl.ds(o * d, d)
                for c in range(cin):
                    w = Wi_ref[base + o * cin + c]          # f32 scalar in SMEM
                    kron_ref[rows, pl.ds(c * d, d)] = (w * Lk).astype(kron_ref.dtype)

            # ONE MXU matmul per L slice over ALL channels:
            #   (tb, cin*d) x (cout*d, cin*d)^T -> (tb, cout*d), f32 accumulate.
            term = jax.lax.dot_general(
                x_cd, kron_ref[...], (((1,), (1,)), ((), ())),
                preferred_element_type=f32)

            if kk == 0:
                @pl.when(kb == 0)
                def _init():
                    acc_ref[...] = x_blk.astype(f32) + term   # residual once
                @pl.when(kb != 0)
                def _accum():
                    acc_ref[...] = acc_ref[...] + term
            else:
                acc_ref[...] = acc_ref[...] + term

        if use_scratch:
            @pl.when(kb == n_kb - 1)
            def _finalize():
                o_ref[...] = acc_ref[...].astype(o_ref.dtype)

    return kernel


def _make_kernel_stream(k_tile, n_kb, compute_dtype, use_scratch):
    """Streaming fallback for large channel counts (channel-major blocks)."""
    f32 = jnp.float32

    def kernel(L_ref, Wi_ref, x_ref, o_ref, *rest):
        acc_ref = rest[0] if use_scratch else o_ref
        kb = pl.program_id(1)

        x_blk = x_ref[...]                                  # (cin, tb, d)
        x_cd = (x_blk if x_blk.dtype == compute_dtype
                else x_blk.astype(compute_dtype))           # cast hoisted, once

        for kk in range(k_tile):
            Lk = L_ref[kk]                                  # (d, d)
            # One fused (cin*tb, d) x (d, d) matmul over all input channels.
            xl = jax.lax.dot_general(x_cd, Lk, (((2,), (1,)), ((), ())),
                                     preferred_element_type=f32)    # (cin,tb,d) f32
            # Tiny-K Wi contraction stays in f32 (no bf16 recast of xl).
            Wk = Wi_ref[kk]                                 # (cout, cin) f32
            term = jax.lax.dot_general(Wk, xl, (((1,), (0,)), ((), ())),
                                       preferred_element_type=f32)  # (cout,tb,d)

            if kk == 0:
                @pl.when(kb == 0)
                def _init():
                    acc_ref[...] = x_blk.astype(f32) + term
                @pl.when(kb != 0)
                def _accum():
                    acc_ref[...] = acc_ref[...] + term
            else:
                acc_ref[...] = acc_ref[...] + term

        if use_scratch:
            @pl.when(kb == n_kb - 1)
            def _finalize():
                o_ref[...] = acc_ref[...].astype(o_ref.dtype)

    return kernel


# --------------------------------------------------------------------------
# wrapper
# --------------------------------------------------------------------------

@functools.partial(jax.jit, static_argnames=("compute_dtype", "block_rows"))
def lconv_core(L, Wi, x, *, compute_dtype=None, block_rows=None):
    """y = einsum('kdf,bcf,koc->bod', L, x, Wi) + x, as a Pallas TPU kernel."""
    num_L, d, d2 = L.shape
    num_L_w, cout, cin = Wi.shape
    b = x.shape[0]
    assert d == d2 and num_L_w == num_L
    assert x.shape == (b, cin, d), (x.shape, (b, cin, d))
    assert cout == cin, "residual connection requires cout == cin"

    out_dtype = x.dtype
    if num_L == 0:                       # empty einsum term -> y = x
        return jnp.asarray(x)

    # MXU operands default to bf16 (f32 accumulation via preferred_element_type,
    # residual / elementwise work stays f32).  x is cast in-kernel so the
    # residual stays exact; cast x in the wrapper instead if residual precision
    # allows and you want to also halve the x HBM read.
    if compute_dtype is None:
        compute_dtype = jnp.bfloat16
    compute_dtype = jnp.dtype(compute_dtype)
    csize = compute_dtype.itemsize
    xsize = jnp.dtype(x.dtype).itemsize
    osize = jnp.dtype(out_dtype).itemsize

    cc = cout * cin
    kron_bytes = (cout * d) * (cin * d) * csize
    fused = (cc <= _PATHA_CC_MAX
             and kron_bytes <= _KRON_MAX_BYTES
             and num_L * cc * 4 <= _SMEM_WI_MAX_BYTES)

    use_scratch = jnp.dtype(out_dtype) != jnp.dtype(jnp.float32)
    cap = _vmem_capacity_bytes()
    budget = int(cap * 0.55)
    limit_cap = int(cap * 0.70)
    row_align = _row_align(x.dtype, out_dtype)

    k_tile = _pick_k_tile(num_L, d, csize, cc, fused)
    n_kb = num_L // k_tile

    L_in = L if jnp.dtype(L.dtype) == compute_dtype else L.astype(compute_dtype)

    if fused:
        # ------------- fused-kron path (native layout, no HBM transposes) ----
        fixed = 2 * k_tile * d * d * csize + kron_bytes + (1 << 20)
        row_bytes = d * (2 * cin * xsize + 2 * cout * osize
                         + (cout * 4 if use_scratch else 0)
                         + (2 * cin + 3 * cout) * 4)
        target_rows = max(row_align,
                          _X_BLOCK_TARGET_BYTES // max(1, cin * d * max(xsize, csize)))
        if block_rows is not None:
            target_rows = int(block_rows)
        tb = _pick_tb(b, row_bytes, fixed, budget, row_align, target_rows)
        nb = pl.cdiv(b, tb)

        kernel = _make_kernel_fused(d, cin, cout, k_tile, n_kb, compute_dtype,
                                    use_scratch)

        x2 = x.reshape(b, cin * d)                    # free view (no copy)
        wi_in = Wi.astype(jnp.float32).reshape(-1)    # flat f32 scalars in SMEM

        scratch = [pltpu.VMEM((cout * d, cin * d), compute_dtype)]
        if use_scratch:
            scratch.append(pltpu.VMEM((tb, cout * d), jnp.float32))

        est = fixed + tb * row_bytes
        vmem_limit = int(min(limit_cap, max(est * 3 // 2, 20 << 20)))
        flops = 2 * num_L * b * (cin * d) * (cout * d) + num_L * cc * d * d
        bytes_accessed = (num_L * d * d * csize + num_L * cc * 4
                          + b * cin * d * xsize + b * cout * d * osize)

        y2 = pl.pallas_call(
            kernel,
            out_shape=jax.ShapeDtypeStruct((b, cout * d), out_dtype),
            grid_spec=pltpu.PrefetchScalarGridSpec(
                num_scalar_prefetch=0,
                grid=(nb, n_kb),                      # k reduction innermost
                in_specs=[
                    pl.BlockSpec((k_tile, d, d), lambda i, kb: (kb, 0, 0)),   # L
                    pl.BlockSpec(memory_space=pltpu.MemorySpace.SMEM),        # Wi
                    pl.BlockSpec((tb, cin * d), lambda i, kb: (i, 0)),        # x
                ],
                # out index_map ignores kb -> block stays resident across the
                # k reduction (accumulator); that axis must stay "arbitrary".
                out_specs=pl.BlockSpec((tb, cout * d), lambda i, kb: (i, 0)),
                scratch_shapes=scratch,
            ),
            compiler_params=pltpu.CompilerParams(
                dimension_semantics=("parallel", "arbitrary"),
                vmem_limit_bytes=vmem_limit),
            cost_estimate=pl.CostEstimate(flops=int(flops), transcendentals=0,
                                          bytes_accessed=int(bytes_accessed)),
        )(L_in, wi_in, x2)
        return y2.reshape(b, cout, d)                 # free view (no copy)

    # ---------------- streaming fallback (large channel counts) --------------
    # TODO(synk): this fallback keeps a channel-major layout, which costs one
    # HBM transpose of x and of y; it only triggers for large cout*cin / d
    # where the kernel is compute-bound and the transpose cost is secondary.
    fixed = 2 * k_tile * d * d * csize + 2 * k_tile * cc * 4 + (1 << 20)
    row_bytes = d * (2 * cin * xsize + 2 * cout * osize
                     + (cout * 4 if use_scratch else 0)
                     + cin * csize + (cin + 2 * cout) * 4)
    target_rows = max(row_align,
                      _X_BLOCK_TARGET_BYTES // max(1, cin * d * max(xsize, csize)))
    if block_rows is not None:
        target_rows = int(block_rows)
    tb = _pick_tb(b, row_bytes, fixed, budget, row_align, target_rows)
    nb = pl.cdiv(b, tb)

    kernel = _make_kernel_stream(k_tile, n_kb, compute_dtype, use_scratch)

    x_cm = jnp.transpose(x, (1, 0, 2))                # (cin, b, d)
    wi_in = Wi.astype(jnp.float32)

    scratch = [pltpu.VMEM((cout, tb, d), jnp.float32)] if use_scratch else []

    est = fixed + tb * row_bytes
    vmem_limit = int(min(limit_cap, max(est * 3 // 2, 20 << 20)))
    flops = 2 * num_L * b * cin * d * d + 2 * num_L * b * cout * cin * d
    bytes_accessed = (num_L * d * d * csize + num_L * cc * 4
                      + 2 * b * cin * d * xsize + 2 * b * cout * d * osize)

    y_cm = pl.pallas_call(
        kernel,
        out_shape=jax.ShapeDtypeStruct((cout, b, d), out_dtype),
        grid_spec=pltpu.PrefetchScalarGridSpec(
            num_scalar_prefetch=0,
            grid=(nb, n_kb),
            in_specs=[
                pl.BlockSpec((k_tile, d, d), lambda i, kb: (kb, 0, 0)),       # L
                pl.BlockSpec((k_tile, cout, cin), lambda i, kb: (kb, 0, 0)),  # Wi
                pl.BlockSpec((cin, tb, d), lambda i, kb: (0, i, 0)),          # x
            ],
            out_specs=pl.BlockSpec((cout, tb, d), lambda i, kb: (0, i, 0)),
            scratch_shapes=scratch,
        ),
        compiler_params=pltpu.CompilerParams(
            dimension_semantics=("parallel", "arbitrary"),
            vmem_limit_bytes=vmem_limit),
        cost_estimate=pl.CostEstimate(flops=int(flops), transcendentals=0,
                                      bytes_accessed=int(bytes_accessed)),
    )(L_in, wi_in, x_cm)
    return jnp.transpose(y_cm, (1, 0, 2))             # back to (b, cout, d)


# ------------------------------ reference / demo -----------------------------

def lconv_reference(L, Wi, x):
    y = jnp.einsum('kdf,bcf,koc->bod',
                   L.astype(jnp.float32), x.astype(jnp.float32),
                   Wi.astype(jnp.float32),
                   precision=jax.lax.Precision.HIGHEST)
    return y + x.astype(jnp.float32)


def _kaiming_normal(key, shape):
    # PyTorch kaiming_normal_ (fan_in mode, gain = sqrt(2)).
    fan_in = 1
    for s in shape[1:]:
        fan_in *= s
    std = (2.0 / fan_in) ** 0.5
    return std * jax.random.normal(key, shape, dtype=jnp.float32)


if __name__ == "__main__":
    def check(name, num_L, d, cin, cout, bsz, compute_dtype, atol, rtol, key):
        kL, kW, kx = jax.random.split(key, 3)
        L = _kaiming_normal(kL, (num_L, d, d))
        Wi = _kaiming_normal(kW, (num_L, cout, cin))
        x = jax.random.normal(kx, (bsz, cin, d), dtype=jnp.float32)

        y = jax.block_until_ready(lconv_core(L, Wi, x, compute_dtype=compute_dtype))
        y_ref = lconv_reference(L, Wi, x)

        assert y.shape == (bsz, cout, d)
        err = float(jnp.max(jnp.abs(y.astype(jnp.float32) - y_ref)))
        assert jnp.allclose(y.astype(jnp.float32), y_ref, atol=atol, rtol=rtol), \
            f"{name}: mismatch vs reference (max abs err {err})"

    key = jax.random.PRNGKey(0)
    k1, k2, k3 = jax.random.split(key, 3)

    # Primary module-like shapes: fused-kron path, f32 end-to-end.
    check("small_f32", 3, 16, 4, 4, 2, jnp.float32, 2e-4, 2e-4, k1)
    # Same shapes with the default bf16 MXU operands (f32 accumulation).
    check("small_bf16_default", 3, 16, 4, 4, 2, None, 7e-2, 7e-2, k1)
    # Multi-step k reduction accumulating in the resident f32 output block.
    check("multi_k_f32", 12, 32, 4, 4, 2, jnp.float32, 2e-4, 2e-4, k2)
    # Wide channels -> streaming channel-major fallback path.
    check("wide_channels_f32", 2, 128, 16, 16, 8, jnp.float32, 2e-4, 2e-4, k3)

    print("KERNEL_OK")
</pallas_src>

<mosaic_0001>
module attributes {stable_mosaic.version = 11 : i64} {
  func.func @kernel(%arg0: i32, %arg1: i32, %arg2: memref<3x16x16xf32, #tpu.memory_space<vmem>>, %arg3: memref<48xf32, #tpu.memory_space<smem>>, %arg4: memref<2x64xf32, #tpu.memory_space<vmem>>, %arg5: memref<2x64xf32, #tpu.memory_space<vmem>>, %arg6: memref<64x64xf32, #tpu.memory_space<vmem>>) attributes {dimension_semantics = [#tpu.dimension_semantics<parallel>, #tpu.dimension_semantics<arbitrary>], iteration_bounds = array<i64: 1, 1>, scalar_prefetch = 0 : i64, scratch_operands = 1 : i64, tpu.core_type = #tpu.core_type<tc>, window_params = [{transform_indices = @transform_0, window_bounds = array<i64: 3, 16, 16>}, {transform_indices = @transform_1, window_bounds = array<i64: 48>}, {transform_indices = @transform_2, window_bounds = array<i64: 2, 64>}, {transform_indices = @transform_3, window_bounds = array<i64: 2, 64>}]} {
    %c0 = arith.constant 0 : index
    %c0_0 = arith.constant 0 : index
    %0 = vector.load %arg4[%c0, %c0_0] : memref<2x64xf32, #tpu.memory_space<vmem>>, vector<2x64xf32>
    %c0_1 = arith.constant 0 : index
    %c0_2 = arith.constant 0 : index
    %c0_3 = arith.constant 0 : index
    %1 = vector.load %arg2[%c0_1, %c0_2, %c0_3] : memref<3x16x16xf32, #tpu.memory_space<vmem>>, vector<1x16x16xf32>
    %2 = vector.shape_cast %1 : vector<1x16x16xf32> to vector<16x16xf32>
    %c3_i32 = arith.constant 3 : i32
    %3 = arith.muli %arg1, %c3_i32 : i32
    %c0_i32 = arith.constant 0 : i32
    %4 = arith.addi %3, %c0_i32 : i32
    %c16_i32 = arith.constant 16 : i32
    %5 = arith.muli %4, %c16_i32 : i32
    %c0_i32_4 = arith.constant 0 : i32
    %6 = arith.addi %5, %c0_i32_4 : i32
    %c0_i32_5 = arith.constant 0 : i32
    %7 = arith.addi %6, %c0_i32_5 : i32
    %8 = arith.index_cast %7 : i32 to index
    %9 = memref.load %arg3[%8] : memref<48xf32, #tpu.memory_space<smem>>
    %10 = vector.broadcast %9 : f32 to vector<16x16xf32>
    %11 = arith.mulf %10, %2 : vector<16x16xf32>
    %c0_6 = arith.constant 0 : index
    %c0_7 = arith.constant 0 : index
    %12 = vector.load %arg6[%c0_6, %c0_7] : memref<64x64xf32, #tpu.memory_space<vmem>>, vector<16x16xf32>
    tpu.vector_store %arg6[%c0_6, %c0_7], %11 {strides = array<i32>} : memref<64x64xf32, #tpu.memory_space<vmem>>, vector<16x16xf32>,
    %c0_i32_8 = arith.constant 0 : i32
    %13 = arith.addi %5, %c0_i32_8 : i32
    %c1_i32 = arith.constant 1 : i32
    %14 = arith.addi %13, %c1_i32 : i32
    %15 = arith.index_cast %14 : i32 to index
    %16 = memref.load %arg3[%15] : memref<48xf32, #tpu.memory_space<smem>>
    %17 = vector.broadcast %16 : f32 to vector<16x16xf32>
    %18 = arith.mulf %17, %2 : vector<16x16xf32>
    %c0_9 = arith.constant 0 : index
    %c16 = arith.constant 16 : index
    %19 = vector.load %arg6[%c0_9, %c16] : memref<64x64xf32, #tpu.memory_space<vmem>>, vector<16x16xf32>
    tpu.vector_store %arg6[%c0_9, %c16], %18 {strides = array<i32>} : memref<64x64xf32, #tpu.memory_space<vmem>>, vector<16x16xf32>,
    %c0_i32_10 = arith.constant 0 : i32
    %20 = arith.addi %5, %c0_i32_10 : i32
    %c2_i32 = arith.constant 2 : i32
    %21 = arith.addi %20, %c2_i32 : i32
    %22 = arith.index_cast %21 : i32 to index
    %23 = memref.load %arg3[%22] : memref<48xf32, #tpu.memory_space<smem>>
    %24 = vector.broadcast %23 : f32 to vector<16x16xf32>
    %25 = arith.mulf %24, %2 : vector<16x16xf32>
    %c0_11 = arith.constant 0 : index
    %c32 = arith.constant 32 : index
    %26 = vector.load %arg6[%c0_11, %c32] : memref<64x64xf32, #tpu.memory_space<vmem>>, vector<16x16xf32>
    tpu.vector_store %arg6[%c0_11, %c32], %25 {strides = array<i32>} : memref<64x64xf32, #tpu.memory_space<vmem>>, vector<16x16xf32>,
    %c0_i32_12 = arith.constant 0 : i32
    %27 = arith.addi %5, %c0_i32_12 : i32
    %c3_i32_13 = arith.constant 3 : i32
    %28 = arith.addi %27, %c3_i32_13 : i32
    %29 = arith.index_cast %28 : i32 to index
    %30 = memref.load %arg3[%29] : memref<48xf32, #tpu.memory_space<smem>>
    %31 = vector.broadcast %30 : f32 to vector<16x16xf32>
    %32 = arith.mulf %31, %2 : vector<16x16xf32>
    %c0_14 = arith.constant 0 : index
    %c48 = arith.constant 48 : index
    %33 = vector.load %arg6[%c0_14, %c48] : memref<64x64xf32, #tpu.memory_space<vmem>>, vector<16x16xf32>
    tpu.vector_store %arg6[%c0_14, %c48], %32 {strides = array<i32>} : memref<64x64xf32, #tpu.memory_space<vmem>>, vector<16x16xf32>,
    %c4_i32 = arith.constant 4 : i32
    %34 = arith.addi %5, %c4_i32 : i32
    %c0_i32_15 = arith.constant 0 : i32
    %35 = arith.addi %34, %c0_i32_15 : i32
    %36 = arith.index_cast %35 : i32 to index
    %37 = memref.load %arg3[%36] : memref<48xf32, #tpu.memory_space<smem>>
    %38 = vector.broadcast %37 : f32 to vector<16x16xf32>
    %39 = arith.mulf %38, %2 : vector<16x16xf32>
    %c16_16 = arith.constant 16 : index
    %c0_17 = arith.constant 0 : index
    %40 = vector.load %arg6[%c16_16, %c0_17] : memref<64x64xf32, #tpu.memory_space<vmem>>, vector<16x16xf32>
    tpu.vector_store %arg6[%c16_16, %c0_17], %39 {strides = array<i32>} : memref<64x64xf32, #tpu.memory_space<vmem>>, vector<16x16xf32>,
    %c4_i32_18 = arith.constant 4 : i32
    %41 = arith.addi %5, %c4_i32_18 : i32
    %c1_i32_19 = arith.constant 1 : i32
    %42 = arith.addi %41, %c1_i32_19 : i32
    %43 = arith.index_cast %42 : i32 to index
    %44 = memref.load %arg3[%43] : memref<48xf32, #tpu.memory_space<smem>>
    %45 = vector.broadcast %44 : f32 to vector<16x16xf32>
    %46 = arith.mulf %45, %2 : vector<16x16xf32>
    %c16_20 = arith.constant 16 : index
    %c16_21 = arith.constant 16 : index
    %47 = vector.load %arg6[%c16_20, %c16_21] : memref<64x64xf32, #tpu.memory_space<vmem>>, vector<16x16xf32>
    tpu.vector_store %arg6[%c16_20, %c16_21], %46 {strides = array<i32>} : memref<64x64xf32, #tpu.memory_space<vmem>>, vector<16x16xf32>,
    %c4_i32_22 = arith.constant 4 : i32
    %48 = arith.addi %5, %c4_i32_22 : i32
    %c2_i32_23 = arith.constant 2 : i32
    %49 = arith.addi %48, %c2_i32_23 : i32
    %50 = arith.index_cast %49 : i32 to index
    %51 = memref.load %arg3[%50] : memref<48xf32, #tpu.memory_space<smem>>
    %52 = vector.broadcast %51 : f32 to vector<16x16xf32>
    %53 = arith.mulf %52, %2 : vector<16x16xf32>
    %c16_24 = arith.constant 16 : index
    %c32_25 = arith.constant 32 : index
    %54 = vector.load %arg6[%c16_24, %c32_25] : memref<64x64xf32, #tpu.memory_space<vmem>>, vector<16x16xf32>
    tpu.vector_store %arg6[%c16_24, %c32_25], %53 {strides = array<i32>} : memref<64x64xf32, #tpu.memory_space<vmem>>, vector<16x16xf32>,
    %c4_i32_26 = arith.constant 4 : i32
    %55 = arith.addi %5, %c4_i32_26 : i32
    %c3_i32_27 = arith.constant 3 : i32
    %56 = arith.addi %55, %c3_i32_27 : i32
    %57 = arith.index_cast %56 : i32 to index
    %58 = memref.load %arg3[%57] : memref<48xf32, #tpu.memory_space<smem>>
    %59 = vector.broadcast %58 : f32 to vector<16x16xf32>
    %60 = arith.mulf %59, %2 : vector<16x16xf32>
    %c16_28 = arith.constant 16 : index
    %c48_29 = arith.constant 48 : index
    %61 = vector.load %arg6[%c16_28, %c48_29] : memref<64x64xf32, #tpu.memory_space<vmem>>, vector<16x16xf32>
    tpu.vector_store %arg6[%c16_28, %c48_29], %60 {strides = array<i32>} : memref<64x64xf32, #tpu.memory_space<vmem>>, vector<16x16xf32>,
    %c8_i32 = arith.constant 8 : i32
    %62 = arith.addi %5, %c8_i32 : i32
    %c0_i32_30 = arith.constant 0 : i32
    %63 = arith.addi %62, %c0_i32_30 : i32
    %64 = arith.index_cast %63 : i32 to index
    %65 = memref.load %arg3[%64] : memref<48xf32, #tpu.memory_space<smem>>
    %66 = vector.broadcast %65 : f32 to vector<16x16xf32>
    %67 = arith.mulf %66, %2 : vector<16x16xf32>
    %c32_31 = arith.constant 32 : index
    %c0_32 = arith.constant 0 : index
    %68 = vector.load %arg6[%c32_31, %c0_32] : memref<64x64xf32, #tpu.memory_space<vmem>>, vector<16x16xf32>
    tpu.vector_store %arg6[%c32_31, %c0_32], %67 {strides = array<i32>} : memref<64x64xf32, #tpu.memory_space<vmem>>, vector<16x16xf32>,
    %c8_i32_33 = arith.constant 8 : i32
    %69 = arith.addi %5, %c8_i32_33 : i32
    %c1_i32_34 = arith.constant 1 : i32
    %70 = arith.addi %69, %c1_i32_34 : i32
    %71 = arith.index_cast %70 : i32 to index
    %72 = memref.load %arg3[%71] : memref<48xf32, #tpu.memory_space<smem>>
    %73 = vector.broadcast %72 : f32 to vector<16x16xf32>
    %74 = arith.mulf %73, %2 : vector<16x16xf32>
    %c32_35 = arith.constant 32 : index
    %c16_36 = arith.constant 16 : index
    %75 = vector.load %arg6[%c32_35, %c16_36] : memref<64x64xf32, #tpu.memory_space<vmem>>, vector<16x16xf32>
    tpu.vector_store %arg6[%c32_35, %c16_36], %74 {strides = array<i32>} : memref<64x64xf32, #tpu.memory_space<vmem>>, vector<16x16xf32>,
    %c8_i32_37 = arith.constant 8 : i32
    %76 = arith.addi %5, %c8_i32_37 : i32
    %c2_i32_38 = arith.constant 2 : i32
    %77 = arith.addi %76, %c2_i32_38 : i32
    %78 = arith.index_cast %77 : i32 to index
    %79 = memref.load %arg3[%78] : memref<48xf32, #tpu.memory_space<smem>>
    %80 = vector.broadcast %79 : f32 to vector<16x16xf32>
    %81 = arith.mulf %80, %2 : vector<16x16xf32>
    %c32_39 = arith.constant 32 : index
    %c32_40 = arith.constant 32 : index
    %82 = vector.load %arg6[%c32_39, %c32_40] : memref<64x64xf32, #tpu.memory_space<vmem>>, vector<16x16xf32>
    tpu.vector_store %arg6[%c32_39, %c32_40], %81 {strides = array<i32>} : memref<64x64xf32, #tpu.memory_space<vmem>>, vector<16x16xf32>,
    %c8_i32_41 = arith.constant 8 : i32
    %83 = arith.addi %5, %c8_i32_41 : i32
    %c3_i32_42 = arith.constant 3 : i32
    %84 = arith.addi %83, %c3_i32_42 : i32
    %85 = arith.index_cast %84 : i32 to index
    %86 = memref.load %arg3[%85] : memref<48xf32, #tpu.memory_space<smem>>
    %87 = vector.broadcast %86 : f32 to vector<16x16xf32>
    %88 = arith.mulf %87, %2 : vector<16x16xf32>
    %c32_43 = arith.constant 32 : index
    %c48_44 = arith.constant 48 : index
    %89 = vector.load %arg6[%c32_43, %c48_44] : memref<64x64xf32, #tpu.memory_space<vmem>>, vector<16x16xf32>
    tpu.vector_store %arg6[%c32_43, %c48_44], %88 {strides = array<i32>} : memref<64x64xf32, #tpu.memory_space<vmem>>, vector<16x16xf32>,
    %c12_i32 = arith.constant 12 : i32
    %90 = arith.addi %5, %c12_i32 : i32
    %c0_i32_45 = arith.constant 0 : i32
    %91 = arith.addi %90, %c0_i32_45 : i32
    %92 = arith.index_cast %91 : i32 to index
    %93 = memref.load %arg3[%92] : memref<48xf32, #tpu.memory_space<smem>>
    %94 = vector.broadcast %93 : f32 to vector<16x16xf32>
    %95 = arith.mulf %94, %2 : vector<16x16xf32>
    %c48_46 = arith.constant 48 : index
    %c0_47 = arith.constant 0 : index
    %96 = vector.load %arg6[%c48_46, %c0_47] : memref<64x64xf32, #tpu.memory_space<vmem>>, vector<16x16xf32>
    tpu.vector_store %arg6[%c48_46, %c0_47], %95 {strides = array<i32>} : memref<64x64xf32, #tpu.memory_space<vmem>>, vector<16x16xf32>,
    %c12_i32_48 = arith.constant 12 : i32
    %97 = arith.addi %5, %c12_i32_48 : i32
    %c1_i32_49 = arith.constant 1 : i32
    %98 = arith.addi %97, %c1_i32_49 : i32
    %99 = arith.index_cast %98 : i32 to index
    %100 = memref.load %arg3[%99] : memref<48xf32, #tpu.memory_space<smem>>
    %101 = vector.broadcast %100 : f32 to vector<16x16xf32>
    %102 = arith.mulf %101, %2 : vector<16x16xf32>
    %c48_50 = arith.constant 48 : index
    %c16_51 = arith.constant 16 : index
    %103 = vector.load %arg6[%c48_50, %c16_51] : memref<64x64xf32, #tpu.memory_space<vmem>>, vector<16x16xf32>
    tpu.vector_store %arg6[%c48_50, %c16_51], %102 {strides = array<i32>} : memref<64x64xf32, #tpu.memory_space<vmem>>, vector<16x16xf32>,
    %c12_i32_52 = arith.constant 12 : i32
    %104 = arith.addi %5, %c12_i32_52 : i32
    %c2_i32_53 = arith.constant 2 : i32
    %105 = arith.addi %104, %c2_i32_53 : i32
    %106 = arith.index_cast %105 : i32 to index
    %107 = memref.load %arg3[%106] : memref<48xf32, #tpu.memory_space<smem>>
    %108 = vector.broadcast %107 : f32 to vector<16x16xf32>
    %109 = arith.mulf %108, %2 : vector<16x16xf32>
    %c48_54 = arith.constant 48 : index
    %c32_55 = arith.constant 32 : index
    %110 = vector.load %arg6[%c48_54, %c32_55] : memref<64x64xf32, #tpu.memory_space<vmem>>, vector<16x16xf32>
    tpu.vector_store %arg6[%c48_54, %c32_55], %109 {strides = array<i32>} : memref<64x64xf32, #tpu.memory_space<vmem>>, vector<16x16xf32>,
    %c12_i32_56 = arith.constant 12 : i32
    %111 = arith.addi %5, %c12_i32_56 : i32
    %c3_i32_57 = arith.constant 3 : i32
    %112 = arith.addi %111, %c3_i32_57 : i32
    %113 = arith.index_cast %112 : i32 to index
    %114 = memref.load %arg3[%113] : memref<48xf32, #tpu.memory_space<smem>>
    %115 = vector.broadcast %114 : f32 to vector<16x16xf32>
    %116 = arith.mulf %115, %2 : vector<16x16xf32>
    %c48_58 = arith.constant 48 : index
    %c48_59 = arith.constant 48 : index
    %117 = vector.load %arg6[%c48_58, %c48_59] : memref<64x64xf32, #tpu.memory_space<vmem>>, vector<16x16xf32>
    tpu.vector_store %arg6[%c48_58, %c48_59], %116 {strides = array<i32>} : memref<64x64xf32, #tpu.memory_space<vmem>>, vector<16x16xf32>,
    %c0_60 = arith.constant 0 : index
    %c0_61 = arith.constant 0 : index
    %118 = vector.load %arg6[%c0_60, %c0_61] : memref<64x64xf32, #tpu.memory_space<vmem>>, vector<64x64xf32>
    %cst = arith.constant dense<0.000000e+00> : vector<2x64xf32>
    %119 = tpu.matmul %0, %118, %cst {dimension_numbers = #tpu.dot_dimension_numbers<[1], [1], [0], [0], [0, 0, 1, 0], [], []>} : vector<2x64xf32>, vector<64x64xf32>, vector<2x64xf32> -> vector<2x64xf32>
    %c0_i32_62 = arith.constant 0 : i32
    %120 = arith.cmpi eq, %arg1, %c0_i32_62 : i32
    %121 = arith.extui %120 : i1 to i32
    %c0_i32_63 = arith.constant 0 : i32
    %122 = arith.cmpi ne, %121, %c0_i32_63 : i32
    scf.if %122 {
      %370 = arith.addf %0, %119 : vector<2x64xf32>
      %c0_218 = arith.constant 0 : index
      %c0_219 = arith.constant 0 : index
      %371 = vector.load %arg5[%c0_218, %c0_219] : memref<2x64xf32, #tpu.memory_space<vmem>>, vector<2x64xf32>
      tpu.vector_store %arg5[%c0_218, %c0_219], %370 {strides = array<i32>} : memref<2x64xf32, #tpu.memory_space<vmem>>, vector<2x64xf32>,
    } else {
    }
    %c0_i32_64 = arith.constant 0 : i32
    %123 = arith.cmpi ne, %arg1, %c0_i32_64 : i32
    %124 = arith.extui %123 : i1 to i32
    %c0_i32_65 = arith.constant 0 : i32
    %125 = arith.cmpi ne, %124, %c0_i32_65 : i32
    scf.if %125 {
      %c0_218 = arith.constant 0 : index
      %c0_219 = arith.constant 0 : index
      %370 = vector.load %arg5[%c0_218, %c0_219] : memref<2x64xf32, #tpu.memory_space<vmem>>, vector<2x64xf32>
      %371 = arith.addf %370, %119 : vector<2x64xf32>
      %c0_220 = arith.constant 0 : index
      %c0_221 = arith.constant 0 : index
      %372 = vector.load %arg5[%c0_220, %c0_221] : memref<2x64xf32, #tpu.memory_space<vmem>>, vector<2x64xf32>
      tpu.vector_store %arg5[%c0_220, %c0_221], %371 {strides = array<i32>} : memref<2x64xf32, #tpu.memory_space<vmem>>, vector<2x64xf32>,
    } else {
    }
    %c1 = arith.constant 1 : index
    %c0_66 = arith.constant 0 : index
    %c0_67 = arith.constant 0 : index
    %126 = vector.load %arg2[%c1, %c0_66, %c0_67] : memref<3x16x16xf32, #tpu.memory_space<vmem>>, vector<1x16x16xf32>
    %127 = vector.shape_cast %126 : vector<1x16x16xf32> to vector<16x16xf32>
    %c3_i32_68 = arith.constant 3 : i32
    %128 = arith.muli %arg1, %c3_i32_68 : i32
    %c1_i32_69 = arith.constant 1 : i32
    %129 = arith.addi %128, %c1_i32_69 : i32
    %c16_i32_70 = arith.constant 16 : i32
    %130 = arith.muli %129, %c16_i32_70 : i32
    %c0_i32_71 = arith.constant 0 : i32
    %131 = arith.addi %130, %c0_i32_71 : i32
    %c0_i32_72 = arith.constant 0 : i32
    %132 = arith.addi %131, %c0_i32_72 : i32
    %133 = arith.index_cast %132 : i32 to index
    %134 = memref.load %arg3[%133] : memref<48xf32, #tpu.memory_space<smem>>
    %135 = vector.broadcast %134 : f32 to vector<16x16xf32>
    %136 = arith.mulf %135, %127 : vector<16x16xf32>
    %c0_73 = arith.constant 0 : index
    %c0_74 = arith.constant 0 : index
    %137 = vector.load %arg6[%c0_73, %c0_74] : memref<64x64xf32, #tpu.memory_space<vmem>>, vector<16x16xf32>
    tpu.vector_store %arg6[%c0_73, %c0_74], %136 {strides = array<i32>} : memref<64x64xf32, #tpu.memory_space<vmem>>, vector<16x16xf32>,
    %c0_i32_75 = arith.constant 0 : i32
    %138 = arith.addi %130, %c0_i32_75 : i32
    %c1_i32_76 = arith.constant 1 : i32
    %139 = arith.addi %138, %c1_i32_76 : i32
    %140 = arith.index_cast %139 : i32 to index
    %141 = memref.load %arg3[%140] : memref<48xf32, #tpu.memory_space<smem>>
    %142 = vector.broadcast %141 : f32 to vector<16x16xf32>
    %143 = arith.mulf %142, %127 : vector<16x16xf32>
    %c0_77 = arith.constant 0 : index
    %c16_78 = arith.constant 16 : index
    %144 = vector.load %arg6[%c0_77, %c16_78] : memref<64x64xf32, #tpu.memory_space<vmem>>, vector<16x16xf32>
    tpu.vector_store %arg6[%c0_77, %c16_78], %143 {strides = array<i32>} : memref<64x64xf32, #tpu.memory_space<vmem>>, vector<16x16xf32>,
    %c0_i32_79 = arith.constant 0 : i32
    %145 = arith.addi %130, %c0_i32_79 : i32
    %c2_i32_80 = arith.constant 2 : i32
    %146 = arith.addi %145, %c2_i32_80 : i32
    %147 = arith.index_cast %146 : i32 to index
    %148 = memref.load %arg3[%147] : memref<48xf32, #tpu.memory_space<smem>>
    %149 = vector.broadcast %148 : f32 to vector<16x16xf32>
    %150 = arith.mulf %149, %127 : vector<16x16xf32>
    %c0_81 = arith.constant 0 : index
    %c32_82 = arith.constant 32 : index
    %151 = vector.load %arg6[%c0_81, %c32_82] : memref<64x64xf32, #tpu.memory_space<vmem>>, vector<16x16xf32>
    tpu.vector_store %arg6[%c0_81, %c32_82], %150 {strides = array<i32>} : memref<64x64xf32, #tpu.memory_space<vmem>>, vector<16x16xf32>,
    %c0_i32_83 = arith.constant 0 : i32
    %152 = arith.addi %130, %c0_i32_83 : i32
    %c3_i32_84 = arith.constant 3 : i32
    %153 = arith.addi %152, %c3_i32_84 : i32
    %154 = arith.index_cast %153 : i32 to index
    %155 = memref.load %arg3[%154] : memref<48xf32, #tpu.memory_space<smem>>
    %156 = vector.broadcast %155 : f32 to vector<16x16xf32>
    %157 = arith.mulf %156, %127 : vector<16x16xf32>
    %c0_85 = arith.constant 0 : index
    %c48_86 = arith.constant 48 : index
    %158 = vector.load %arg6[%c0_85, %c48_86] : memref<64x64xf32, #tpu.memory_space<vmem>>, vector<16x16xf32>
    tpu.vector_store %arg6[%c0_85, %c48_86], %157 {strides = array<i32>} : memref<64x64xf32, #tpu.memory_space<vmem>>, vector<16x16xf32>,
    %c4_i32_87 = arith.constant 4 : i32
    %159 = arith.addi %130, %c4_i32_87 : i32
    %c0_i32_88 = arith.constant 0 : i32
    %160 = arith.addi %159, %c0_i32_88 : i32
    %161 = arith.index_cast %160 : i32 to index
    %162 = memref.load %arg3[%161] : memref<48xf32, #tpu.memory_space<smem>>
    %163 = vector.broadcast %162 : f32 to vector<16x16xf32>
    %164 = arith.mulf %163, %127 : vector<16x16xf32>
    %c16_89 = arith.constant 16 : index
    %c0_90 = arith.constant 0 : index
    %165 = vector.load %arg6[%c16_89, %c0_90] : memref<64x64xf32, #tpu.memory_space<vmem>>, vector<16x16xf32>
    tpu.vector_store %arg6[%c16_89, %c0_90], %164 {strides = array<i32>} : memref<64x64xf32, #tpu.memory_space<vmem>>, vector<16x16xf32>,
    %c4_i32_91 = arith.constant 4 : i32
    %166 = arith.addi %130, %c4_i32_91 : i32
    %c1_i32_92 = arith.constant 1 : i32
    %167 = arith.addi %166, %c1_i32_92 : i32
    %168 = arith.index_cast %167 : i32 to index
    %169 = memref.load %arg3[%168] : memref<48xf32, #tpu.memory_space<smem>>
    %170 = vector.broadcast %169 : f32 to vector<16x16xf32>
    %171 = arith.mulf %170, %127 : vector<16x16xf32>
    %c16_93 = arith.constant 16 : index
    %c16_94 = arith.constant 16 : index
    %172 = vector.load %arg6[%c16_93, %c16_94] : memref<64x64xf32, #tpu.memory_space<vmem>>, vector<16x16xf32>
    tpu.vector_store %arg6[%c16_93, %c16_94], %171 {strides = array<i32>} : memref<64x64xf32, #tpu.memory_space<vmem>>, vector<16x16xf32>,
    %c4_i32_95 = arith.constant 4 : i32
    %173 = arith.addi %130, %c4_i32_95 : i32
    %c2_i32_96 = arith.constant 2 : i32
    %174 = arith.addi %173, %c2_i32_96 : i32
    %175 = arith.index_cast %174 : i32 to index
    %176 = memref.load %arg3[%175] : memref<48xf32, #tpu.memory_space<smem>>
    %177 = vector.broadcast %176 : f32 to vector<16x16xf32>
    %178 = arith.mulf %177, %127 : vector<16x16xf32>
    %c16_97 = arith.constant 16 : index
    %c32_98 = arith.constant 32 : index
    %179 = vector.load %arg6[%c16_97, %c32_98] : memref<64x64xf32, #tpu.memory_space<vmem>>, vector<16x16xf32>
    tpu.vector_store %arg6[%c16_97, %c32_98], %178 {strides = array<i32>} : memref<64x64xf32, #tpu.memory_space<vmem>>, vector<16x16xf32>,
    %c4_i32_99 = arith.constant 4 : i32
    %180 = arith.addi %130, %c4_i32_99 : i32
    %c3_i32_100 = arith.constant 3 : i32
    %181 = arith.addi %180, %c3_i32_100 : i32
    %182 = arith.index_cast %181 : i32 to index
    %183 = memref.load %arg3[%182] : memref<48xf32, #tpu.memory_space<smem>>
    %184 = vector.broadcast %183 : f32 to vector<16x16xf32>
    %185 = arith.mulf %184, %127 : vector<16x16xf32>
    %c16_101 = arith.constant 16 : index
    %c48_102 = arith.constant 48 : index
    %186 = vector.load %arg6[%c16_101, %c48_102] : memref<64x64xf32, #tpu.memory_space<vmem>>, vector<16x16xf32>
    tpu.vector_store %arg6[%c16_101, %c48_102], %185 {strides = array<i32>} : memref<64x64xf32, #tpu.memory_space<vmem>>, vector<16x16xf32>,
    %c8_i32_103 = arith.constant 8 : i32
    %187 = arith.addi %130, %c8_i32_103 : i32
    %c0_i32_104 = arith.constant 0 : i32
    %188 = arith.addi %187, %c0_i32_104 : i32
    %189 = arith.index_cast %188 : i32 to index
    %190 = memref.load %arg3[%189] : memref<48xf32, #tpu.memory_space<smem>>
    %191 = vector.broadcast %190 : f32 to vector<16x16xf32>
    %192 = arith.mulf %191, %127 : vector<16x16xf32>
    %c32_105 = arith.constant 32 : index
    %c0_106 = arith.constant 0 : index
    %193 = vector.load %arg6[%c32_105, %c0_106] : memref<64x64xf32, #tpu.memory_space<vmem>>, vector<16x16xf32>
    tpu.vector_store %arg6[%c32_105, %c0_106], %192 {strides = array<i32>} : memref<64x64xf32, #tpu.memory_space<vmem>>, vector<16x16xf32>,
    %c8_i32_107 = arith.constant 8 : i32
    %194 = arith.addi %130, %c8_i32_107 : i32
    %c1_i32_108 = arith.constant 1 : i32
    %195 = arith.addi %194, %c1_i32_108 : i32
    %196 = arith.index_cast %195 : i32 to index
    %197 = memref.load %arg3[%196] : memref<48xf32, #tpu.memory_space<smem>>
    %198 = vector.broadcast %197 : f32 to vector<16x16xf32>
    %199 = arith.mulf %198, %127 : vector<16x16xf32>
    %c32_109 = arith.constant 32 : index
    %c16_110 = arith.constant 16 : index
    %200 = vector.load %arg6[%c32_109, %c16_110] : memref<64x64xf32, #tpu.memory_space<vmem>>, vector<16x16xf32>
    tpu.vector_store %arg6[%c32_109, %c16_110], %199 {strides = array<i32>} : memref<64x64xf32, #tpu.memory_space<vmem>>, vector<16x16xf32>,
    %c8_i32_111 = arith.constant 8 : i32
    %201 = arith.addi %130, %c8_i32_111 : i32
    %c2_i32_112 = arith.constant 2 : i32
    %202 = arith.addi %201, %c2_i32_112 : i32
    %203 = arith.index_cast %202 : i32 to index
    %204 = memref.load %arg3[%203] : memref<48xf32, #tpu.memory_space<smem>>
    %205 = vector.broadcast %204 : f32 to vector<16x16xf32>
    %206 = arith.mulf %205, %127 : vector<16x16xf32>
    %c32_113 = arith.constant 32 : index
    %c32_114 = arith.constant 32 : index
    %207 = vector.load %arg6[%c32_113, %c32_114] : memref<64x64xf32, #tpu.memory_space<vmem>>, vector<16x16xf32>
    tpu.vector_store %arg6[%c32_113, %c32_114], %206 {strides = array<i32>} : memref<64x64xf32, #tpu.memory_space<vmem>>, vector<16x16xf32>,
    %c8_i32_115 = arith.constant 8 : i32
    %208 = arith.addi %130, %c8_i32_115 : i32
    %c3_i32_116 = arith.constant 3 : i32
    %209 = arith.addi %208, %c3_i32_116 : i32
    %210 = arith.index_cast %209 : i32 to index
    %211 = memref.load %arg3[%210] : memref<48xf32, #tpu.memory_space<smem>>
    %212 = vector.broadcast %211 : f32 to vector<16x16xf32>
    %213 = arith.mulf %212, %127 : vector<16x16xf32>
    %c32_117 = arith.constant 32 : index
    %c48_118 = arith.constant 48 : index
    %214 = vector.load %arg6[%c32_117, %c48_118] : memref<64x64xf32, #tpu.memory_space<vmem>>, vector<16x16xf32>
    tpu.vector_store %arg6[%c32_117, %c48_118], %213 {strides = array<i32>} : memref<64x64xf32, #tpu.memory_space<vmem>>, vector<16x16xf32>,
    %c12_i32_119 = arith.constant 12 : i32
    %215 = arith.addi %130, %c12_i32_119 : i32
    %c0_i32_120 = arith.constant 0 : i32
    %216 = arith.addi %215, %c0_i32_120 : i32
    %217 = arith.index_cast %216 : i32 to index
    %218 = memref.load %arg3[%217] : memref<48xf32, #tpu.memory_space<smem>>
    %219 = vector.broadcast %218 : f32 to vector<16x16xf32>
    %220 = arith.mulf %219, %127 : vector<16x16xf32>
    %c48_121 = arith.constant 48 : index
    %c0_122 = arith.constant 0 : index
    %221 = vector.load %arg6[%c48_121, %c0_122] : memref<64x64xf32, #tpu.memory_space<vmem>>, vector<16x16xf32>
    tpu.vector_store %arg6[%c48_121, %c0_122], %220 {strides = array<i32>} : memref<64x64xf32, #tpu.memory_space<vmem>>, vector<16x16xf32>,
    %c12_i32_123 = arith.constant 12 : i32
    %222 = arith.addi %130, %c12_i32_123 : i32
    %c1_i32_124 = arith.constant 1 : i32
    %223 = arith.addi %222, %c1_i32_124 : i32
    %224 = arith.index_cast %223 : i32 to index
    %225 = memref.load %arg3[%224] : memref<48xf32, #tpu.memory_space<smem>>
    %226 = vector.broadcast %225 : f32 to vector<16x16xf32>
    %227 = arith.mulf %226, %127 : vector<16x16xf32>
    %c48_125 = arith.constant 48 : index
    %c16_126 = arith.constant 16 : index
    %228 = vector.load %arg6[%c48_125, %c16_126] : memref<64x64xf32, #tpu.memory_space<vmem>>, vector<16x16xf32>
    tpu.vector_store %arg6[%c48_125, %c16_126], %227 {strides = array<i32>} : memref<64x64xf32, #tpu.memory_space<vmem>>, vector<16x16xf32>,
    %c12_i32_127 = arith.constant 12 : i32
    %229 = arith.addi %130, %c12_i32_127 : i32
    %c2_i32_128 = arith.constant 2 : i32
    %230 = arith.addi %229, %c2_i32_128 : i32
    %231 = arith.index_cast %230 : i32 to index
    %232 = memref.load %arg3[%231] : memref<48xf32, #tpu.memory_space<smem>>
    %233 = vector.broadcast %232 : f32 to vector<16x16xf32>
    %234 = arith.mulf %233, %127 : vector<16x16xf32>
    %c48_129 = arith.constant 48 : index
    %c32_130 = arith.constant 32 : index
    %235 = vector.load %arg6[%c48_129, %c32_130] : memref<64x64xf32, #tpu.memory_space<vmem>>, vector<16x16xf32>
    tpu.vector_store %arg6[%c48_129, %c32_130], %234 {strides = array<i32>} : memref<64x64xf32, #tpu.memory_space<vmem>>, vector<16x16xf32>,
    %c12_i32_131 = arith.constant 12 : i32
    %236 = arith.addi %130, %c12_i32_131 : i32
    %c3_i32_132 = arith.constant 3 : i32
    %237 = arith.addi %236, %c3_i32_132 : i32
    %238 = arith.index_cast %237 : i32 to index
    %239 = memref.load %arg3[%238] : memref<48xf32, #tpu.memory_space<smem>>
    %240 = vector.broadcast %239 : f32 to vector<16x16xf32>
    %241 = arith.mulf %240, %127 : vector<16x16xf32>
    %c48_133 = arith.constant 48 : index
    %c48_134 = arith.constant 48 : index
    %242 = vector.load %arg6[%c48_133, %c48_134] : memref<64x64xf32, #tpu.memory_space<vmem>>, vector<16x16xf32>
    tpu.vector_store %arg6[%c48_133, %c48_134], %241 {strides = array<i32>} : memref<64x64xf32, #tpu.memory_space<vmem>>, vector<16x16xf32>,
    %c0_135 = arith.constant 0 : index
    %c0_136 = arith.constant 0 : index
    %243 = vector.load %arg6[%c0_135, %c0_136] : memref<64x64xf32, #tpu.memory_space<vmem>>, vector<64x64xf32>
    %cst_137 = arith.constant dense<0.000000e+00> : vector<2x64xf32>
    %244 = tpu.matmul %0, %243, %cst_137 {dimension_numbers = #tpu.dot_dimension_numbers<[1], [1], [0], [0], [0, 0, 1, 0], [], []>} : vector<2x64xf32>, vector<64x64xf32>, vector<2x64xf32> -> vector<2x64xf32>
    %c0_138 = arith.constant 0 : index
    %c0_139 = arith.constant 0 : index
    %245 = vector.load %arg5[%c0_138, %c0_139] : memref<2x64xf32, #tpu.memory_space<vmem>>, vector<2x64xf32>
    %246 = arith.addf %245, %244 : vector<2x64xf32>
    %c0_140 = arith.constant 0 : index
    %c0_141 = arith.constant 0 : index
    %247 = vector.load %arg5[%c0_140, %c0_141] : memref<2x64xf32, #tpu.memory_space<vmem>>, vector<2x64xf32>
    tpu.vector_store %arg5[%c0_140, %c0_141], %246 {strides = array<i32>} : memref<2x64xf32, #tpu.memory_space<vmem>>, vector<2x64xf32>,
    %c2 = arith.constant 2 : index
    %c0_142 = arith.constant 0 : index
    %c0_143 = arith.constant 0 : index
    %248 = vector.load %arg2[%c2, %c0_142, %c0_143] : memref<3x16x16xf32, #tpu.memory_space<vmem>>, vector<1x16x16xf32>
    %249 = vector.shape_cast %248 : vector<1x16x16xf32> to vector<16x16xf32>
    %c3_i32_144 = arith.constant 3 : i32
    %250 = arith.muli %arg1, %c3_i32_144 : i32
    %c2_i32_145 = arith.constant 2 : i32
    %251 = arith.addi %250, %c2_i32_145 : i32
    %c16_i32_146 = arith.constant 16 : i32
    %252 = arith.muli %251, %c16_i32_146 : i32
    %c0_i32_147 = arith.constant 0 : i32
    %253 = arith.addi %252, %c0_i32_147 : i32
    %c0_i32_148 = arith.constant 0 : i32
    %254 = arith.addi %253, %c0_i32_148 : i32
    %255 = arith.index_cast %254 : i32 to index
    %256 = memref.load %arg3[%255] : memref<48xf32, #tpu.memory_space<smem>>
    %257 = vector.broadcast %256 : f32 to vector<16x16xf32>
    %258 = arith.mulf %257, %249 : vector<16x16xf32>
    %c0_149 = arith.constant 0 : index
    %c0_150 = arith.constant 0 : index
    %259 = vector.load %arg6[%c0_149, %c0_150] : memref<64x64xf32, #tpu.memory_space<vmem>>, vector<16x16xf32>
    tpu.vector_store %arg6[%c0_149, %c0_150], %258 {strides = array<i32>} : memref<64x64xf32, #tpu.memory_space<vmem>>, vector<16x16xf32>,
    %c0_i32_151 = arith.constant 0 : i32
    %260 = arith.addi %252, %c0_i32_151 : i32
    %c1_i32_152 = arith.constant 1 : i32
    %261 = arith.addi %260, %c1_i32_152 : i32
    %262 = arith.index_cast %261 : i32 to index
    %263 = memref.load %arg3[%262] : memref<48xf32, #tpu.memory_space<smem>>
    %264 = vector.broadcast %263 : f32 to vector<16x16xf32>
    %265 = arith.mulf %264, %249 : vector<16x16xf32>
    %c0_153 = arith.constant 0 : index
    %c16_154 = arith.constant 16 : index
    %266 = vector.load %arg6[%c0_153, %c16_154] : memref<64x64xf32, #tpu.memory_space<vmem>>, vector<16x16xf32>
    tpu.vector_store %arg6[%c0_153, %c16_154], %265 {strides = array<i32>} : memref<64x64xf32, #tpu.memory_space<vmem>>, vector<16x16xf32>,
    %c0_i32_155 = arith.constant 0 : i32
    %267 = arith.addi %252, %c0_i32_155 : i32
    %c2_i32_156 = arith.constant 2 : i32
    %268 = arith.addi %267, %c2_i32_156 : i32
    %269 = arith.index_cast %268 : i32 to index
    %270 = memref.load %arg3[%269] : memref<48xf32, #tpu.memory_space<smem>>
    %271 = vector.broadcast %270 : f32 to vector<16x16xf32>
    %272 = arith.mulf %271, %249 : vector<16x16xf32>
    %c0_157 = arith.constant 0 : index
    %c32_158 = arith.constant 32 : index
    %273 = vector.load %arg6[%c0_157, %c32_158] : memref<64x64xf32, #tpu.memory_space<vmem>>, vector<16x16xf32>
    tpu.vector_store %arg6[%c0_157, %c32_158], %272 {strides = array<i32>} : memref<64x64xf32, #tpu.memory_space<vmem>>, vector<16x16xf32>,
    %c0_i32_159 = arith.constant 0 : i32
    %274 = arith.addi %252, %c0_i32_159 : i32
    %c3_i32_160 = arith.constant 3 : i32
    %275 = arith.addi %274, %c3_i32_160 : i32
    %276 = arith.index_cast %275 : i32 to index
    %277 = memref.load %arg3[%276] : memref<48xf32, #tpu.memory_space<smem>>
    %278 = vector.broadcast %277 : f32 to vector<16x16xf32>
    %279 = arith.mulf %278, %249 : vector<16x16xf32>
    %c0_161 = arith.constant 0 : index
    %c48_162 = arith.constant 48 : index
    %280 = vector.load %arg6[%c0_161, %c48_162] : memref<64x64xf32, #tpu.memory_space<vmem>>, vector<16x16xf32>
    tpu.vector_store %arg6[%c0_161, %c48_162], %279 {strides = array<i32>} : memref<64x64xf32, #tpu.memory_space<vmem>>, vector<16x16xf32>,
    %c4_i32_163 = arith.constant 4 : i32
    %281 = arith.addi %252, %c4_i32_163 : i32
    %c0_i32_164 = arith.constant 0 : i32
    %282 = arith.addi %281, %c0_i32_164 : i32
    %283 = arith.index_cast %282 : i32 to index
    %284 = memref.load %arg3[%283] : memref<48xf32, #tpu.memory_space<smem>>
    %285 = vector.broadcast %284 : f32 to vector<16x16xf32>
    %286 = arith.mulf %285, %249 : vector<16x16xf32>
    %c16_165 = arith.constant 16 : index
    %c0_166 = arith.constant 0 : index
    %287 = vector.load %arg6[%c16_165, %c0_166] : memref<64x64xf32, #tpu.memory_space<vmem>>, vector<16x16xf32>
    tpu.vector_store %arg6[%c16_165, %c0_166], %286 {strides = array<i32>} : memref<64x64xf32, #tpu.memory_space<vmem>>, vector<16x16xf32>,
    %c4_i32_167 = arith.constant 4 : i32
    %288 = arith.addi %252, %c4_i32_167 : i32
    %c1_i32_168 = arith.constant 1 : i32
    %289 = arith.addi %288, %c1_i32_168 : i32
    %290 = arith.index_cast %289 : i32 to index
    %291 = memref.load %arg3[%290] : memref<48xf32, #tpu.memory_space<smem>>
    %292 = vector.broadcast %291 : f32 to vector<16x16xf32>
    %293 = arith.mulf %292, %249 : vector<16x16xf32>
    %c16_169 = arith.constant 16 : index
    %c16_170 = arith.constant 16 : index
    %294 = vector.load %arg6[%c16_169, %c16_170] : memref<64x64xf32, #tpu.memory_space<vmem>>, vector<16x16xf32>
    tpu.vector_store %arg6[%c16_169, %c16_170], %293 {strides = array<i32>} : memref<64x64xf32, #tpu.memory_space<vmem>>, vector<16x16xf32>,
    %c4_i32_171 = arith.constant 4 : i32
    %295 = arith.addi %252, %c4_i32_171 : i32
    %c2_i32_172 = arith.constant 2 : i32
    %296 = arith.addi %295, %c2_i32_172 : i32
    %297 = arith.index_cast %296 : i32 to index
    %298 = memref.load %arg3[%297] : memref<48xf32, #tpu.memory_space<smem>>
    %299 = vector.broadcast %298 : f32 to vector<16x16xf32>
    %300 = arith.mulf %299, %249 : vector<16x16xf32>
    %c16_173 = arith.constant 16 : index
    %c32_174 = arith.constant 32 : index
    %301 = vector.load %arg6[%c16_173, %c32_174] : memref<64x64xf32, #tpu.memory_space<vmem>>, vector<16x16xf32>
    tpu.vector_store %arg6[%c16_173, %c32_174], %300 {strides = array<i32>} : memref<64x64xf32, #tpu.memory_space<vmem>>, vector<16x16xf32>,
    %c4_i32_175 = arith.constant 4 : i32
    %302 = arith.addi %252, %c4_i32_175 : i32
    %c3_i32_176 = arith.constant 3 : i32
    %303 = arith.addi %302, %c3_i32_176 : i32
    %304 = arith.index_cast %303 : i32 to index
    %305 = memref.load %arg3[%304] : memref<48xf32, #tpu.memory_space<smem>>
    %306 = vector.broadcast %305 : f32 to vector<16x16xf32>
    %307 = arith.mulf %306, %249 : vector<16x16xf32>
    %c16_177 = arith.constant 16 : index
    %c48_178 = arith.constant 48 : index
    %308 = vector.load %arg6[%c16_177, %c48_178] : memref<64x64xf32, #tpu.memory_space<vmem>>, vector<16x16xf32>
    tpu.vector_store %arg6[%c16_177, %c48_178], %307 {strides = array<i32>} : memref<64x64xf32, #tpu.memory_space<vmem>>, vector<16x16xf32>,
    %c8_i32_179 = arith.constant 8 : i32
    %309 = arith.addi %252, %c8_i32_179 : i32
    %c0_i32_180 = arith.constant 0 : i32
    %310 = arith.addi %309, %c0_i32_180 : i32
    %311 = arith.index_cast %310 : i32 to index
    %312 = memref.load %arg3[%311] : memref<48xf32, #tpu.memory_space<smem>>
    %313 = vector.broadcast %312 : f32 to vector<16x16xf32>
    %314 = arith.mulf %313, %249 : vector<16x16xf32>
    %c32_181 = arith.constant 32 : index
    %c0_182 = arith.constant 0 : index
    %315 = vector.load %arg6[%c32_181, %c0_182] : memref<64x64xf32, #tpu.memory_space<vmem>>, vector<16x16xf32>
    tpu.vector_store %arg6[%c32_181, %c0_182], %314 {strides = array<i32>} : memref<64x64xf32, #tpu.memory_space<vmem>>, vector<16x16xf32>,
    %c8_i32_183 = arith.constant 8 : i32
    %316 = arith.addi %252, %c8_i32_183 : i32
    %c1_i32_184 = arith.constant 1 : i32
    %317 = arith.addi %316, %c1_i32_184 : i32
    %318 = arith.index_cast %317 : i32 to index
    %319 = memref.load %arg3[%318] : memref<48xf32, #tpu.memory_space<smem>>
    %320 = vector.broadcast %319 : f32 to vector<16x16xf32>
    %321 = arith.mulf %320, %249 : vector<16x16xf32>
    %c32_185 = arith.constant 32 : index
    %c16_186 = arith.constant 16 : index
    %322 = vector.load %arg6[%c32_185, %c16_186] : memref<64x64xf32, #tpu.memory_space<vmem>>, vector<16x16xf32>
    tpu.vector_store %arg6[%c32_185, %c16_186], %321 {strides = array<i32>} : memref<64x64xf32, #tpu.memory_space<vmem>>, vector<16x16xf32>,
    %c8_i32_187 = arith.constant 8 : i32
    %323 = arith.addi %252, %c8_i32_187 : i32
    %c2_i32_188 = arith.constant 2 : i32
    %324 = arith.addi %323, %c2_i32_188 : i32
    %325 = arith.index_cast %324 : i32 to index
    %326 = memref.load %arg3[%325] : memref<48xf32, #tpu.memory_space<smem>>
    %327 = vector.broadcast %326 : f32 to vector<16x16xf32>
    %328 = arith.mulf %327, %249 : vector<16x16xf32>
    %c32_189 = arith.constant 32 : index
    %c32_190 = arith.constant 32 : index
    %329 = vector.load %arg6[%c32_189, %c32_190] : memref<64x64xf32, #tpu.memory_space<vmem>>, vector<16x16xf32>
    tpu.vector_store %arg6[%c32_189, %c32_190], %328 {strides = array<i32>} : memref<64x64xf32, #tpu.memory_space<vmem>>, vector<16x16xf32>,
    %c8_i32_191 = arith.constant 8 : i32
    %330 = arith.addi %252, %c8_i32_191 : i32
    %c3_i32_192 = arith.constant 3 : i32
    %331 = arith.addi %330, %c3_i32_192 : i32
    %332 = arith.index_cast %331 : i32 to index
    %333 = memref.load %arg3[%332] : memref<48xf32, #tpu.memory_space<smem>>
    %334 = vector.broadcast %333 : f32 to vector<16x16xf32>
    %335 = arith.mulf %334, %249 : vector<16x16xf32>
    %c32_193 = arith.constant 32 : index
    %c48_194 = arith.constant 48 : index
    %336 = vector.load %arg6[%c32_193, %c48_194] : memref<64x64xf32, #tpu.memory_space<vmem>>, vector<16x16xf32>
    tpu.vector_store %arg6[%c32_193, %c48_194], %335 {strides = array<i32>} : memref<64x64xf32, #tpu.memory_space<vmem>>, vector<16x16xf32>,
    %c12_i32_195 = arith.constant 12 : i32
    %337 = arith.addi %252, %c12_i32_195 : i32
    %c0_i32_196 = arith.constant 0 : i32
    %338 = arith.addi %337, %c0_i32_196 : i32
    %339 = arith.index_cast %338 : i32 to index
    %340 = memref.load %arg3[%339] : memref<48xf32, #tpu.memory_space<smem>>
    %341 = vector.broadcast %340 : f32 to vector<16x16xf32>
    %342 = arith.mulf %341, %249 : vector<16x16xf32>
    %c48_197 = arith.constant 48 : index
    %c0_198 = arith.constant 0 : index
    %343 = vector.load %arg6[%c48_197, %c0_198] : memref<64x64xf32, #tpu.memory_space<vmem>>, vector<16x16xf32>
    tpu.vector_store %arg6[%c48_197, %c0_198], %342 {strides = array<i32>} : memref<64x64xf32, #tpu.memory_space<vmem>>, vector<16x16xf32>,
    %c12_i32_199 = arith.constant 12 : i32
    %344 = arith.addi %252, %c12_i32_199 : i32
    %c1_i32_200 = arith.constant 1 : i32
    %345 = arith.addi %344, %c1_i32_200 : i32
    %346 = arith.index_cast %345 : i32 to index
    %347 = memref.load %arg3[%346] : memref<48xf32, #tpu.memory_space<smem>>
    %348 = vector.broadcast %347 : f32 to vector<16x16xf32>
    %349 = arith.mulf %348, %249 : vector<16x16xf32>
    %c48_201 = arith.constant 48 : index
    %c16_202 = arith.constant 16 : index
    %350 = vector.load %arg6[%c48_201, %c16_202] : memref<64x64xf32, #tpu.memory_space<vmem>>, vector<16x16xf32>
    tpu.vector_store %arg6[%c48_201, %c16_202], %349 {strides = array<i32>} : memref<64x64xf32, #tpu.memory_space<vmem>>, vector<16x16xf32>,
    %c12_i32_203 = arith.constant 12 : i32
    %351 = arith.addi %252, %c12_i32_203 : i32
    %c2_i32_204 = arith.constant 2 : i32
    %352 = arith.addi %351, %c2_i32_204 : i32
    %353 = arith.index_cast %352 : i32 to index
    %354 = memref.load %arg3[%353] : memref<48xf32, #tpu.memory_space<smem>>
    %355 = vector.broadcast %354 : f32 to vector<16x16xf32>
    %356 = arith.mulf %355, %249 : vector<16x16xf32>
    %c48_205 = arith.constant 48 : index
    %c32_206 = arith.constant 32 : index
    %357 = vector.load %arg6[%c48_205, %c32_206] : memref<64x64xf32, #tpu.memory_space<vmem>>, vector<16x16xf32>
    tpu.vector_store %arg6[%c48_205, %c32_206], %356 {strides = array<i32>} : memref<64x64xf32, #tpu.memory_space<vmem>>, vector<16x16xf32>,
    %c12_i32_207 = arith.constant 12 : i32
    %358 = arith.addi %252, %c12_i32_207 : i32
    %c3_i32_208 = arith.constant 3 : i32
    %359 = arith.addi %358, %c3_i32_208 : i32
    %360 = arith.index_cast %359 : i32 to index
    %361 = memref.load %arg3[%360] : memref<48xf32, #tpu.memory_space<smem>>
    %362 = vector.broadcast %361 : f32 to vector<16x16xf32>
    %363 = arith.mulf %362, %249 : vector<16x16xf32>
    %c48_209 = arith.constant 48 : index
    %c48_210 = arith.constant 48 : index
    %364 = vector.load %arg6[%c48_209, %c48_210] : memref<64x64xf32, #tpu.memory_space<vmem>>, vector<16x16xf32>
    tpu.vector_store %arg6[%c48_209, %c48_210], %363 {strides = array<i32>} : memref<64x64xf32, #tpu.memory_space<vmem>>, vector<16x16xf32>,
    %c0_211 = arith.constant 0 : index
    %c0_212 = arith.constant 0 : index
    %365 = vector.load %arg6[%c0_211, %c0_212] : memref<64x64xf32, #tpu.memory_space<vmem>>, vector<64x64xf32>
    %cst_213 = arith.constant dense<0.000000e+00> : vector<2x64xf32>
    %366 = tpu.matmul %0, %365, %cst_213 {dimension_numbers = #tpu.dot_dimension_numbers<[1], [1], [0], [0], [0, 0, 1, 0], [], []>} : vector<2x64xf32>, vector<64x64xf32>, vector<2x64xf32> -> vector<2x64xf32>
    %c0_214 = arith.constant 0 : index
    %c0_215 = arith.constant 0 : index
    %367 = vector.load %arg5[%c0_214, %c0_215] : memref<2x64xf32, #tpu.memory_space<vmem>>, vector<2x64xf32>
    %368 = arith.addf %367, %366 : vector<2x64xf32>
    %c0_216 = arith.constant 0 : index
    %c0_217 = arith.constant 0 : index
    %369 = vector.load %arg5[%c0_216, %c0_217] : memref<2x64xf32, #tpu.memory_space<vmem>>, vector<2x64xf32>
    tpu.vector_store %arg5[%c0_216, %c0_217], %368 {strides = array<i32>} : memref<2x64xf32, #tpu.memory_space<vmem>>, vector<2x64xf32>,
    return
  }
  func.func @transform_0(%arg0: i32, %arg1: i32) -> (i32, i32, i32) {
    %c0_i32 = arith.constant 0 : i32
    %c0_i32_0 = arith.constant 0 : i32
    %c0_i32_1 = arith.constant 0 : i32
    return %arg1, %c0_i32, %c0_i32_0 : i32, i32, i32
  }
  func.func @transform_1(%arg0: i32, %arg1: i32) -> i32 {
    %c0_i32 = arith.constant 0 : i32
    %c0_i32_0 = arith.constant 0 : i32
    return %c0_i32 : i32
  }
  func.func @transform_2(%arg0: i32, %arg1: i32) -> (i32, i32) {
    %c0_i32 = arith.constant 0 : i32
    %c0_i32_0 = arith.constant 0 : i32
    return %arg0, %c0_i32 : i32, i32
  }
  func.func @transform_3(%arg0: i32, %arg1: i32) -> (i32, i32) {
    %c0_i32 = arith.constant 0 : i32
    %c0_i32_0 = arith.constant 0 : i32
    return %arg0, %c0_i32 : i32, i32
  }
}

</mosaic_0001>

<bundles_post_ra>
// kernel: lconv_core.1
= control target key start
LH: loop header
LB: loop body
LE: loop exit
PB: predicated region body
PF: predicated region fallthrough
CT: control target
= control target key end

     0   :  { %8 = vsyncpa [#allocation4], 0  ;;  %s1696_s0 = inlined_call_operand.hbm [shape: f32[3,16,16], index: 0, kind: input, shape index: {}]   ;;  %s1697_s1 = inlined_call_operand.vmem [shape: f32[48], index: 1, kind: input, shape index: {}]   ;;  %s1698_s2 = inlined_call_operand.vmem [shape: f32[2,64], index: 2, kind: input, shape index: {}]   ;;  %s1699_s3 = inlined_call_operand.vmem [shape: f32[2,64], index: 3, kind: output, shape index: {}]  }
   0x1   :  { %9 = vsyncpa [#allocation5], 0  ;;  %s1273_s12 = smov [#allocation3]   ;;  %s28_s16 = sshll.u32 %s1697_s1, 4  ;;  %s29_s16 = int_to_ptr.vmem [resolvable:$true] %s28_s16 }
   0x2   :  { %s15_s13 = sshll.u32 %s1273_s12, 4  ;;  %s1235_s19 = scalar_lea.hbm %s1696_s0, 768  ;;  %s16_s13 = int_to_ptr.vmem [resolvable:$true] %s15_s13 }
   0x3   :  { %p1236_p0 = scmp.ne.s32.totalorder %s1696_s0, %s1235_s19  ;;  %p1239_p1 = scmp.lt.u32.totalorder %s1235_s19, %s1696_s0 }
   0x5   :  { %p1241_p2 = pnand %p1239_p1, %p1236_p0 }
   0x7   :  { %1244 = shalt.err (!%p1241_p2)
}
   0x8   :  { %s1245_s24 = scalar_lea.vmem %s16_s13, 768  ;;  %p1250_p4 = scmp.lt.s32.totalorder %s16_s13, %s16_s13 }
   0x9   :  { %p1246_p3 = scmp.ne.s32.totalorder %s16_s13, %s1245_s24  ;;  %p1251_p5 = scmp.lt.s32.totalorder %s1245_s24, %s1245_s24 }
   0xb   :  { %p1252_p6 = por %p1251_p5, %p1250_p4 }
   0xd   :  { %p1253_p7 = pnand %p1252_p6, %p1246_p3 }
   0xf   :  { %1256 = shalt.err (!%p1253_p7)
}
  0x10   :  { %s1274_s1 = smov 128   ;;  %s1275_s25 = smov 8  }
  0x11   :  { %21 = dma.hbm_to_vmem [thread:$0]  %s1696_s0, 768, %s16_s13, [#allocation4], %s1274_s1, %s1274_s1, %s1275_s25  }
  0x12   :  { %s1257_s28 = scalar_lea.vmem %s29_s16, 16  ;;  %p1262_p9 = scmp.lt.s32.totalorder %s29_s16, %s29_s16 }
  0x13   :  { %p1258_p8 = scmp.ne.s32.totalorder %s29_s16, %s1257_s28  ;;  %p1263_p10 = scmp.lt.s32.totalorder %s1257_s28, %s1257_s28 }
  0x15   :  { %p1264_p11 = por %p1263_p10, %p1262_p9 }
  0x17   :  { %p1265_p12 = pnand %p1264_p11, %p1258_p8 }
  0x19   :  { %1268 = shalt.err (!%p1265_p12)
}
  0x1a   :  { %s1276_s29 = smov [#allocation6]  }
  0x1b   :  { %31 = dma.vmem_to_smem %s29_s16, 16, %s1276_s29, [#allocation5]  }
  0x1c   :  { %1269 = dma.done.wait [#allocation4], 768  }
  0x1d   :  { %1270 = vsyncadd [#allocation4], 4294966528 }
  0x1e   :  { %1271 = dma.done.wait [#allocation5], 16  }
  0x1f   :  { %1272 = vsyncadd [#allocation5], 4294967280 }
  0x20   :  { %40 = sfence }
  0x21   :  { %s1020_s30 = sld [smem:[#allocation6 + $0x2]]  ;;  %s1019_s4 = sld [smem:[#allocation6 + $0x1]]  ;;  %v1318_v0 = vld [vmem:[#allocation3] sm:$0xff]  ;;  %v1320_v1 = vld [vmem:[#allocation3 + $0x8] sm:$0xff]  ;;  %v1279_v12 = vmov 0.0|0.0   ;;  %vm49_vm0 = vcmask 130048  }
  0x22   :  { %s1021_s5 = sld [smem:[#allocation6 + $0x3]]  ;;  %s1023_s0 = sld [smem:[#allocation6 + $0x5]]  ;;  %1177 = vmatprep.subr.bf16.mxu0 %v1279_v12  ;;  %1193 = vmatprep.subr.bf16.mxu1 %v1279_v12  ;;  %v1375_v39 = vld [vmem:[#allocation3 + $0x18] sm:$0xff]  ;;  %v1378_v41 = vld [vmem:[#allocation3 + $0x10] sm:$0xff]  ;;  %vm1281_vm1 = vmmov 0   ;;  %vm65_vm2 = vcmask 261248  }
  0x23   :  { %s1277_s6 = smov 32   ;;  %s1278_s7 = smov 16   ;;  %vm81_vm3 = vcmask 392448   ;;  %vm97_vm4 = vcmask 523648   ;;  %vm264_vm5 = vcmask 523264   ;;  %vm367_vm7 = vcmask 517120  }
  0x24   :  { %s1024_s8 = sld [smem:[#allocation6 + $0x6]]  ;;  %s1025_s9 = sld [smem:[#allocation6 + $0x7]]  ;;  %vm1524_vm6 = vmpackc.low %vm264_vm5, %vm264_vm5 }
  0x25   :  { %s1280_s10 = smov 48   ;;  %s1027_s11 = sld [smem:[#allocation6 + $0x9]] }
  0x26   :  { %s1028_s12 = sld [smem:[#allocation6 + $0xa]]  ;;  %s45_s13 = sld [smem:[#allocation6]] }
  0x27   :  { %v70_v2 = vstv %s1020_s30  ;;  %v54_v4 = vstv %s1019_s4  ;;  %s1022_s14 = sld [smem:[#allocation6 + $0x4]]  ;;  %s1346_s15 = sld [smem:[#allocation6 + $0xb]] }
  0x28   :  { %v71_v3 = vmul.f32 %v70_v2, %v1318_v0  ;;  %v55_v5 = vmul.f32 %v54_v4, %v1318_v0  ;;  %v72_v6 = vmul.f32 %v70_v2, %v1320_v1  ;;  %v56_v7 = vmul.f32 %v54_v4, %v1320_v1  ;;  %s1026_s16 = sld [smem:[#allocation6 + $0x8]]  ;;  %s1352_s17 = sld [smem:[#allocation6 + $0x11]] }
  0x29   :  { %v86_v8 = vstv %s1021_s5  ;;  %v109_v11 = vstv %s1023_s0  ;;  %s1365_s18 = sld [smem:[#allocation6 + $0x12]]  ;;  %s1030_s19 = sld [smem:[#allocation6 + $0xc]] }
  0x2a   :  { %75 = vrot.lane.b32.xlu1 %v71_v3, %s1277_s6  ;;  %59 = vrot.lane.b32.xlu0 %v55_v5, %s1278_s7  ;;  %v88_v9 = vmul.f32 %v86_v8, %v1320_v1  ;;  %v87_v10 = vmul.f32 %v86_v8, %v1318_v0  ;;  %v111_v13 = vmul.f32 %v109_v11, %v1320_v1  ;;  %v124_v15 = vstv %s1024_s8  ;;  %s1046_s20 = sld [smem:[#allocation6 + $0x13]]  ;;  %s1031_s21 = sld [smem:[#allocation6 + $0xd]] }
  0x2b   :  { %v110_v14 = vmul.f32 %v109_v11, %v1318_v0  ;;  %v126_v16 = vmul.f32 %v124_v15, %v1320_v1  ;;  %v125_v17 = vmul.f32 %v124_v15, %v1318_v0  ;;  %v139_v18 = vstv %s1025_s9  ;;  %s1032_s22 = sld [smem:[#allocation6 + $0xe]]  ;;  %s1033_s23 = sld [smem:[#allocation6 + $0xf]] }
  0x2c   :  { %v141_v19 = vmul.f32 %v139_v18, %v1320_v1  ;;  %v140_v20 = vmul.f32 %v139_v18, %v1318_v0  ;;  %v161_v21 = vstv %s1027_s11  ;;  %v176_v24 = vstv %s1028_s12  ;;  %s1048_s24 = sld [smem:[#allocation6 + $0x15]]  ;;  %s1049_s1 = sld [smem:[#allocation6 + $0x16]] }
  0x2d   :  { %v163_v22 = vmul.f32 %v161_v21, %v1320_v1  ;;  %v162_v23 = vmul.f32 %v161_v21, %v1318_v0  ;;  %v46_v25 = vstv %s45_s13  ;;  %v102_v28 = vstv %s1022_s14  ;;  %s1050_s25 = sld [smem:[#allocation6 + $0x17]]  ;;  %s1069_s26 = sld [smem:[#allocation6 + $0x21]] }
  0x2e   :  { %77 = vrot.lane.b32.xlu1 %v72_v6, %s1277_s6  ;;  %61 = vrot.lane.b32.xlu0 %v56_v7, %s1278_s7  ;;  %v47_v26 = vmul.f32 %v46_v25, %v1318_v0  ;;  %v48_v27 = vmul.f32 %v46_v25, %v1320_v1  ;;  %v178_v29 = vmul.f32 %v176_v24, %v1320_v1  ;;  %v191_v33 = vstv %s1346_s15  ;;  %s1070_s27 = sld [smem:[#allocation6 + $0x22]]  ;;  %v1423_v7 = vld [vmem:[#allocation3 + $0x28] sm:$0xff]  ;;  %s1071_s28 = sld [smem:[#allocation6 + $0x23]] }
  0x2f   :  { %v104_v30 = vmul.f32 %v102_v28, %v1320_v1  ;;  %v103_v31 = vmul.f32 %v102_v28, %v1318_v0  ;;  %v177_v32 = vmul.f32 %v176_v24, %v1318_v0  ;;  %v154_v34 = vstv %s1026_s16  ;;  %s1052_s29 = sld [smem:[#allocation6 + $0x19]]  ;;  %s1053_s30 = sld [smem:[#allocation6 + $0x1a]] }
  0x30   :  { %50 = vst.msk [vmem:[#allocation2] sm:$0xff] %vm49_vm0, %v47_v26  ;;  %51 = vst.msk [vmem:[#allocation2 + $0x8] sm:$0xff] %vm49_vm0, %v48_v27  ;;  %v193_v35 = vmul.f32 %v191_v33, %v1320_v1  ;;  %v156_v36 = vmul.f32 %v154_v34, %v1320_v1  ;;  %v155_v37 = vmul.f32 %v154_v34, %v1318_v0  ;;  %v391_v40 = vstv %s1352_s17  ;;  %s1054_s4 = sld [smem:[#allocation6 + $0x1b]]  ;;  %s1073_s5 = sld [smem:[#allocation6 + $0x25]] }
  0x31   :  { %106 = vst.msk [vmem:[#allocation2 + $0x18] sm:$0xff] %vm49_vm0, %v104_v30  ;;  %105 = vst.msk [vmem:[#allocation2 + $0x10] sm:$0xff] %vm49_vm0, %v103_v31  ;;  %v192_v38 = vmul.f32 %v191_v33, %v1318_v0  ;;  %v393_v42 = vmul.f32 %v391_v40, %v1375_v39  ;;  %v206_v43 = vstv %s1030_s19  ;;  %v392_v44 = vmul.f32 %v391_v40, %v1378_v41  ;;  %s1074_s0 = sld [smem:[#allocation6 + $0x26]]  ;;  %s1075_s8 = sld [smem:[#allocation6 + $0x27]] }
  0x32   :  { %93 = vrot.lane.b32.xlu1 %v88_v9, %s1280_s10  ;;  %91 = vrot.lane.b32.xlu0 %v87_v10, %s1280_s10  ;;  %158 = vst.msk [vmem:[#allocation2 + $0x28] sm:$0xff] %vm49_vm0, %v156_v36  ;;  %157 = vst.msk [vmem:[#allocation2 + $0x20] sm:$0xff] %vm49_vm0, %v155_v37  ;;  %v406_v45 = vstv %s1365_s18  ;;  %v208_v46 = vmul.f32 %v206_v43, %v1320_v1  ;;  %v207_v47 = vmul.f32 %v206_v43, %v1318_v0  ;;  %v1425_v9 = vld [vmem:[#allocation3 + $0x20] sm:$0xff]  ;;  %s1056_s9 = sld [smem:[#allocation6 + $0x1d]]  ;;  %s1057_s11 = sld [smem:[#allocation6 + $0x1e]] }
  0x33   :  { %v408_v48 = vmul.f32 %v406_v45, %v1375_v39  ;;  %v407_v49 = vmul.f32 %v406_v45, %v1378_v41  ;;  %v421_v50 = vstv %s1046_s20  ;;  %v213_v53 = vstv %s1031_s21  ;;  %s1058_s12 = sld [smem:[#allocation6 + $0x1f]]  ;;  %s1077_s13 = sld [smem:[#allocation6 + $0x29]] }
  0x34   :  { %210 = vst.msk [vmem:[#allocation2 + $0x38] sm:$0xff] %vm49_vm0, %v208_v46  ;;  %209 = vst.msk [vmem:[#allocation2 + $0x30] sm:$0xff] %vm49_vm0, %v207_v47  ;;  %v423_v51 = vmul.f32 %v421_v50, %v1375_v39  ;;  %v422_v52 = vmul.f32 %v421_v50, %v1378_v41  ;;  %v215_v54 = vmul.f32 %v213_v53, %v1320_v1  ;;  %v228_v56 = vstv %s1032_s22  ;;  %s1078_s14 = sld [smem:[#allocation6 + $0x2a]]  ;;  %s1479_s15 = sld [smem:[#allocation6 + $0x2b]] }
  0x35   :  { %v214_v55 = vmul.f32 %v213_v53, %v1318_v0  ;;  %v230_v57 = vmul.f32 %v228_v56, %v1320_v1  ;;  %v229_v58 = vmul.f32 %v228_v56, %v1318_v0  ;;  %v243_v59 = vstv %s1033_s23  ;;  %s1484_s16 = sld [smem:[#allocation6 + $0x10]]  ;;  %s1489_s17 = sld [smem:[#allocation6 + $0x2d]] }
  0x36   :  { %116 = vrot.lane.b32.xlu1 %v111_v13, %s1278_s7  ;;  %114 = vrot.lane.b32.xlu0 %v110_v14, %s1278_s7  ;;  %v245_v60 = vmul.f32 %v243_v59, %v1320_v1  ;;  %v244_v61 = vmul.f32 %v243_v59, %v1318_v0  ;;  %v443_v62 = vstv %s1048_s24  ;;  %v458_v3 = vstv %s1049_s1  ;;  %s1498_s18 = sld [smem:[#allocation6 + $0x2e]]  ;;  %s1508_s19 = sld [smem:[#allocation6 + $0x2f]] }
  0x37   :  { %v445_v63 = vmul.f32 %v443_v62, %v1375_v39  ;;  %v444_v2 = vmul.f32 %v443_v62, %v1378_v41  ;;  %v460_v1 = vmul.f32 %v458_v3, %v1375_v39  ;;  %v459_v0 = vmul.f32 %v458_v3, %v1378_v41  ;;  %s1516_s20 = sld [smem:[#allocation6 + $0x14]] }
  0x38   :  { %v473_v4 = vstv %s1050_s25  ;;  %v709_v8 = vstv %s1069_s26  ;;  %v724_v13 = vstv %s1070_s27  ;;  %v525_v26 = vstv %s1054_s4  ;;  %s1072_s21 = sld [smem:[#allocation6 + $0x24]] }
  0x39   :  { %v475_v5 = vmul.f32 %v473_v4, %v1375_v39  ;;  %v474_v6 = vmul.f32 %v473_v4, %v1378_v41  ;;  %v711_v10 = vmul.f32 %v709_v8, %v1423_v7  ;;  %v710_v11 = vmul.f32 %v709_v8, %v1425_v9  ;;  %s1080_s24 = sld [smem:[#allocation6 + $0x2c]] }
  0x3a   :  { %131 = vrot.lane.b32.xlu1 %v126_v16, %s1277_s6  ;;  %129 = vrot.lane.b32.xlu0 %v125_v17, %s1277_s6  ;;  %v726_v14 = vmul.f32 %v724_v13, %v1423_v7  ;;  %v725_v15 = vmul.f32 %v724_v13, %v1425_v9  ;;  %v739_v16 = vstv %s1071_s28  ;;  %v527_v27 = vmul.f32 %v525_v26, %v1375_v39 }
  0x3b   :  { %v741_v17 = vmul.f32 %v739_v16, %v1423_v7  ;;  %v740_v18 = vmul.f32 %v739_v16, %v1425_v9  ;;  %v526_v28 = vmul.f32 %v525_v26, %v1378_v41  ;;  %v562_v43 = vstv %s1057_s11 }
  0x3c   :  { %v563_v45 = vmul.f32 %v562_v43, %v1378_v41  ;;  %v577_v46 = vstv %s1058_s12  ;;  %v843_v59 = vstv %s1479_s15  ;;  %v865_v3 = vstv %s1489_s17 }
  0x3d   :  { %v579_v47 = vmul.f32 %v577_v46, %v1375_v39  ;;  %v845_v62 = vmul.f32 %v843_v59, %v1423_v7  ;;  %v866_v8 = vmul.f32 %v865_v3, %v1425_v9 }
  0x3e   :  { %146 = vrot.lane.b32.xlu1 %v141_v19, %s1280_s10  ;;  %144 = vrot.lane.b32.xlu0 %v140_v20, %s1280_s10  ;;  %v495_v19 = vstv %s1052_s29  ;;  %v1282_v20 = vmov 0.0  }
  0x3f   :  { %1136 = vmatprep.mubr.msk.f32.mxu0 %vm1281_vm1, %v1282_v20  ;;  %1155 = vmatprep.mubr.msk.f32.mxu1 %vm1281_vm1, %v1282_v20  ;;  %v497_v21 = vmul.f32 %v495_v19, %v1375_v39 }
  0x42   :  { %168 = vrot.lane.b32.xlu1 %v163_v22, %s1278_s7  ;;  %166 = vrot.lane.b32.xlu0 %v162_v23, %s1278_s7  ;;  %v496_v22 = vmul.f32 %v495_v19, %v1378_v41  ;;  %v510_v23 = vstv %s1053_s30 }
  0x43   :  { %v512_v24 = vmul.f32 %v510_v23, %v1375_v39  ;;  %v511_v25 = vmul.f32 %v510_v23, %v1378_v41 }
  0x46   :  { %183 = vrot.lane.b32.xlu1 %v178_v29, %s1277_s6  ;;  %181 = vrot.lane.b32.xlu0 %v177_v32, %s1277_s6  ;;  %v761_v29 = vstv %s1073_s5  ;;  %v776_v32 = vstv %s1074_s0 }
  0x47   :  { %v763_v30 = vmul.f32 %v761_v29, %v1423_v7  ;;  %v762_v31 = vmul.f32 %v761_v29, %v1425_v9  ;;  %v778_v33 = vmul.f32 %v776_v32, %v1423_v7  ;;  %v777_v34 = vmul.f32 %v776_v32, %v1425_v9 }
  0x4a   :  { %198 = vrot.lane.b32.xlu1 %v193_v35, %s1280_s10  ;;  %196 = vrot.lane.b32.xlu0 %v192_v38, %s1280_s10  ;;  %v791_v35 = vstv %s1075_s8  ;;  %v547_v38 = vstv %s1056_s9 }
  0x4b   :  { %v793_v36 = vmul.f32 %v791_v35, %v1423_v7  ;;  %v792_v37 = vmul.f32 %v791_v35, %v1425_v9  ;;  %v549_v40 = vmul.f32 %v547_v38, %v1375_v39 }
  0x4e   :  { %398 = vrot.lane.b32.xlu1 %v393_v42, %s1278_s7  ;;  %396 = vrot.lane.b32.xlu0 %v392_v44, %s1278_s7  ;;  %v548_v42 = vmul.f32 %v547_v38, %v1378_v41  ;;  %v564_v44 = vmul.f32 %v562_v43, %v1375_v39 }
  0x52   :  { %413 = vrot.lane.b32.xlu1 %v408_v48, %s1277_s6  ;;  %411 = vrot.lane.b32.xlu0 %v407_v49, %s1277_s6  ;;  %v578_v48 = vmul.f32 %v577_v46, %v1378_v41  ;;  %v813_v49 = vstv %s1077_s13 }
  0x53   :  { %v814_v53 = vmul.f32 %v813_v49, %v1425_v9 }
  0x56   :  { %428 = vrot.lane.b32.xlu1 %v423_v51, %s1280_s10  ;;  %426 = vrot.lane.b32.xlu0 %v422_v52, %s1280_s10  ;;  %v815_v52 = vmul.f32 %v813_v49, %v1423_v7 }
  0x5a   :  { %220 = vrot.lane.b32.xlu1 %v215_v54, %s1278_s7  ;;  %218 = vrot.lane.b32.xlu0 %v214_v55, %s1278_s7  ;;  %v828_v54 = vstv %s1078_s14 }
  0x5e   :  { %235 = vrot.lane.b32.xlu1 %v230_v57, %s1277_s6  ;;  %233 = vrot.lane.b32.xlu0 %v229_v58, %s1277_s6  ;;  %v830_v57 = vmul.f32 %v828_v54, %v1423_v7  ;;  %v829_v58 = vmul.f32 %v828_v54, %v1425_v9 }
  0x62   :  { %250 = vrot.lane.b32.xlu1 %v245_v60, %s1280_s10  ;;  %248 = vrot.lane.b32.xlu0 %v244_v61, %s1280_s10 }
  0x66   :  { %450 = vrot.lane.b32.xlu1 %v445_v63, %s1278_s7  ;;  %448 = vrot.lane.b32.xlu0 %v444_v2, %s1278_s7  ;;  %v384_v63 = vstv %s1484_s16  ;;  %v844_v2 = vmul.f32 %v843_v59, %v1425_v9 }
  0x67   :  { %v386_v4 = vmul.f32 %v384_v63, %v1375_v39 }
  0x6a   :  { %465 = vrot.lane.b32.xlu1 %v460_v1, %s1277_s6  ;;  %463 = vrot.lane.b32.xlu0 %v459_v0, %s1277_s6 }
  0x6e   :  { %480 = vrot.lane.b32.xlu1 %v475_v5, %s1280_s10  ;;  %478 = vrot.lane.b32.xlu0 %v474_v6, %s1280_s10  ;;  %v867_v5 = vmul.f32 %v865_v3, %v1423_v7  ;;  %v385_v6 = vmul.f32 %v384_v63, %v1378_v41 }
  0x72   :  { %716 = vrot.lane.b32.xlu1 %v711_v10, %s1278_s7  ;;  %714 = vrot.lane.b32.xlu0 %v710_v11, %s1278_s7  ;;  %v880_v10 = vstv %s1498_s18 }
  0x73   :  { %v881_v19 = vmul.f32 %v880_v10, %v1425_v9 }
  0x76   :  { %731 = vrot.lane.b32.xlu1 %v726_v14, %s1277_s6  ;;  %729 = vrot.lane.b32.xlu0 %v725_v15, %s1277_s6 }
  0x7a   :  { %746 = vrot.lane.b32.xlu1 %v741_v17, %s1280_s10  ;;  %744 = vrot.lane.b32.xlu0 %v740_v18, %s1280_s10  ;;  %v882_v18 = vmul.f32 %v880_v10, %v1423_v7 }
  0x7e   :  { %502 = vrot.lane.b32.xlu1 %v497_v21, %s1278_s7  ;;  %500 = vrot.lane.b32.xlu0 %v496_v22, %s1278_s7  ;;  %v895_v21 = vstv %s1508_s19 }
  0x7f   :  { %v896_v26 = vmul.f32 %v895_v21, %v1425_v9 }
  0x82   :  { %517 = vrot.lane.b32.xlu1 %v512_v24, %s1277_s6  ;;  %515 = vrot.lane.b32.xlu0 %v511_v25, %s1277_s6  ;;  %v897_v24 = vmul.f32 %v895_v21, %v1423_v7  ;;  %v436_v25 = vstv %s1516_s20 }
  0x83   :  { %v438_v29 = vmul.f32 %v436_v25, %v1375_v39 }
  0x86   :  { %532 = vrot.lane.b32.xlu1 %v527_v27, %s1280_s10  ;;  %530 = vrot.lane.b32.xlu0 %v526_v28, %s1280_s10 }
  0x8a   :  { %768 = vrot.lane.b32.xlu1 %v763_v30, %s1278_s7  ;;  %766 = vrot.lane.b32.xlu0 %v762_v31, %s1278_s7  ;;  %v437_v30 = vmul.f32 %v436_v25, %v1378_v41 }
  0x8e   :  { %783 = vrot.lane.b32.xlu1 %v778_v33, %s1277_s6  ;;  %781 = vrot.lane.b32.xlu0 %v777_v34, %s1277_s6 }
  0x92   :  { %798 = vrot.lane.b32.xlu1 %v793_v36, %s1280_s10  ;;  %796 = vrot.lane.b32.xlu0 %v792_v37, %s1280_s10 }
  0x96   :  { %554 = vrot.lane.b32.xlu1 %v549_v40, %s1278_s7  ;;  %552 = vrot.lane.b32.xlu0 %v548_v42, %s1278_s7 }
  0x9a   :  { %569 = vrot.lane.b32.xlu1 %v564_v44, %s1277_s6  ;;  %567 = vrot.lane.b32.xlu0 %v563_v45, %s1277_s6 }
  0x9c   :  { %v76_v50 = vpop.permute.xlu1 %75  ;;  %v60_v51 = vpop.permute.xlu0 %59 }
  0x9d   :  { %66 = vst.msk [vmem:[#allocation2] sm:$0xff] %vm65_vm2, %v60_v51 }
  0x9e   :  { %584 = vrot.lane.b32.xlu1 %v579_v47, %s1280_s10  ;;  %582 = vrot.lane.b32.xlu0 %v578_v48, %s1280_s10  ;;  %82 = vst.msk [vmem:[#allocation2] sm:$0xff] %vm81_vm3, %v76_v50 }
  0xa0   :  { %v78_v55 = vpop.permute.xlu1 %77  ;;  %v62_v56 = vpop.permute.xlu0 %61 }
  0xa1   :  { %67 = vst.msk [vmem:[#allocation2 + $0x8] sm:$0xff] %vm65_vm2, %v62_v56 }
  0xa2   :  { %820 = vrot.lane.b32.xlu1 %v815_v52, %s1278_s7  ;;  %818 = vrot.lane.b32.xlu0 %v814_v53, %s1278_s7  ;;  %83 = vst.msk [vmem:[#allocation2 + $0x8] sm:$0xff] %vm81_vm3, %v78_v55 }
  0xa4   :  { %v94_v60 = vpop.permute.xlu1 %93  ;;  %v92_v61 = vpop.permute.xlu0 %91 }
  0xa5   :  { %99 = vst.msk [vmem:[#allocation2 + $0x8] sm:$0xff] %vm97_vm4, %v94_v60  ;;  %98 = vst.msk [vmem:[#allocation2] sm:$0xff] %vm97_vm4, %v92_v61 }
  0xa6   :  { %835 = vrot.lane.b32.xlu1 %v830_v57, %s1277_s6  ;;  %833 = vrot.lane.b32.xlu0 %v829_v58, %s1277_s6 }
  0xa8   :  { %v117_v1 = vpop.permute.xlu1 %116  ;;  %v115_v0 = vpop.permute.xlu0 %114 }
  0xa9   :  { %121 = vst.msk [vmem:[#allocation2 + $0x18] sm:$0xff] %vm65_vm2, %v117_v1  ;;  %120 = vst.msk [vmem:[#allocation2 + $0x10] sm:$0xff] %vm65_vm2, %v115_v0 }
  0xaa   :  { %850 = vrot.lane.b32.xlu1 %v845_v62, %s1280_s10  ;;  %848 = vrot.lane.b32.xlu0 %v844_v2, %s1280_s10 }
  0xac   :  { %v132_v11 = vpop.permute.xlu1 %131  ;;  %v257_v13 = vld [vmem:[#allocation2 + $0x8] sm:$0xff]  ;;  %v130_v14 = vpop.permute.xlu0 %129  ;;  %v256_v15 = vld [vmem:[#allocation2] sm:$0xff] }
  0xad   :  { %136 = vst.msk [vmem:[#allocation2 + $0x18] sm:$0xff] %vm81_vm3, %v132_v11  ;;  %135 = vst.msk [vmem:[#allocation2 + $0x10] sm:$0xff] %vm81_vm3, %v130_v14  ;;  %v1178_v17 = vpack.c.bf16 %v257_v13, %v256_v15  ;;  %v754_v13 = vstv %s1072_s21  ;;  %v1603_v15 = vld [vmem:[%s1698_s2] sm:$0x3]  ;;  %s1076_s2 = sld [smem:[#allocation6 + $0x28]] }
  0xae   :  { %388 = vst.msk [vmem:[#allocation2 + $0x8] sm:$0xff] %vm49_vm0, %v386_v4  ;;  %872 = vrot.lane.b32.xlu1 %v867_v5, %s1278_s7  ;;  %387 = vst.msk [vmem:[#allocation2] sm:$0xff] %vm49_vm0, %v385_v6  ;;  %870 = vrot.lane.b32.xlu0 %v866_v8, %s1278_s7  ;;  %s1051_s7 = sld [smem:[#allocation6 + $0x18]] }
  0xaf   :  { %1180 = vmatpush3.bf16.xpose.msk.msra.mxu0 %vm1524_vm6, %v1178_v17 }
  0xb0   :  { %v147_v22 = vpop.permute.xlu1 %146  ;;  %v145_v23 = vpop.permute.xlu0 %144  ;;  %1181 = vmatprep.subr.bf16.mxu0 %v1279_v12 }
  0xb1   :  { %151 = vst.msk [vmem:[#allocation2 + $0x18] sm:$0xff] %vm97_vm4, %v147_v22  ;;  %150 = vst.msk [vmem:[#allocation2 + $0x10] sm:$0xff] %vm97_vm4, %v145_v23 }
  0xb2   :  { %887 = vrot.lane.b32.xlu1 %v882_v18, %s1277_s6  ;;  %885 = vrot.lane.b32.xlu0 %v881_v19, %s1277_s6  ;;  %s1068_s6 = sld [smem:[#allocation6 + $0x20]]  ;;  %v756_v18 = vmul.f32 %v754_v13, %v1423_v7  ;;  %v755_v19 = vmul.f32 %v754_v13, %v1425_v9 }
  0xb4   :  { %v169_v27 = vpop.permute.xlu1 %168  ;;  %v167_v28 = vpop.permute.xlu0 %166  ;;  %v488_v38 = vstv %s1051_s7 }
  0xb5   :  { %173 = vst.msk [vmem:[#allocation2 + $0x28] sm:$0xff] %vm65_vm2, %v169_v27  ;;  %172 = vst.msk [vmem:[#allocation2 + $0x20] sm:$0xff] %vm65_vm2, %v167_v28  ;;  %v490_v43 = vmul.f32 %v488_v38, %v1375_v39  ;;  %v489_v44 = vmul.f32 %v488_v38, %v1378_v41 }
  0xb6   :  { %902 = vrot.lane.b32.xlu1 %v897_v24, %s1280_s10  ;;  %900 = vrot.lane.b32.xlu0 %v896_v26, %s1280_s10  ;;  %s1055_s10 = sld [smem:[#allocation6 + $0x1c]] }
  0xb8   :  { %v184_v31 = vpop.permute.xlu1 %183  ;;  %v259_v32 = vld [vmem:[#allocation2 + $0x18] sm:$0xff]  ;;  %v182_v33 = vpop.permute.xlu0 %181  ;;  %v258_v34 = vld [vmem:[#allocation2 + $0x10] sm:$0xff]  ;;  %v702_v52 = vstv %s1068_s6 }
  0xb9   :  { %188 = vst.msk [vmem:[#allocation2 + $0x28] sm:$0xff] %vm81_vm3, %v184_v31  ;;  %187 = vst.msk [vmem:[#allocation2 + $0x20] sm:$0xff] %vm81_vm3, %v182_v33  ;;  %v1182_v35 = vpack.c.bf16 %v259_v32, %v258_v34  ;;  %v704_v55 = vmul.f32 %v702_v52, %v1423_v7  ;;  %v703_v56 = vmul.f32 %v702_v52, %v1425_v9 }
  0xba   :  { %440 = vst.msk [vmem:[#allocation2 + $0x18] sm:$0xff] %vm49_vm0, %v438_v29  ;;  %439 = vst.msk [vmem:[#allocation2 + $0x10] sm:$0xff] %vm49_vm0, %v437_v30 }
  0xbb   :  { %1184 = vmatpush3.bf16.xpose.msk.msra.mxu0 %vm1524_vm6, %v1182_v35 }
  0xbc   :  { %v199_v36 = vpop.permute.xlu1 %198  ;;  %v197_v37 = vpop.permute.xlu0 %196  ;;  %1185 = vmatprep.subr.bf16.mxu0 %v1279_v12  ;;  %v540_v2 = vstv %s1055_s10 }
  0xbd   :  { %203 = vst.msk [vmem:[#allocation2 + $0x28] sm:$0xff] %vm97_vm4, %v199_v36  ;;  %202 = vst.msk [vmem:[#allocation2 + $0x20] sm:$0xff] %vm97_vm4, %v197_v37  ;;  %v542_v0 = vmul.f32 %v540_v2, %v1375_v39  ;;  %v541_v4 = vmul.f32 %v540_v2, %v1378_v41  ;;  %v806_v36 = vstv %s1076_s2 }
  0xc0   :  { %v399_v40 = vpop.permute.xlu1 %398  ;;  %v397_v42 = vpop.permute.xlu0 %396 }
  0xc1   :  { %403 = vst.msk [vmem:[#allocation2 + $0x8] sm:$0xff] %vm65_vm2, %v399_v40  ;;  %402 = vst.msk [vmem:[#allocation2] sm:$0xff] %vm65_vm2, %v397_v42  ;;  %v808_v40 = vmul.f32 %v806_v36, %v1423_v7  ;;  %v807_v42 = vmul.f32 %v806_v36, %v1425_v9 }
  0xc4   :  { %v414_v45 = vpop.permute.xlu1 %413  ;;  %v261_v46 = vld [vmem:[#allocation2 + $0x28] sm:$0xff]  ;;  %v412_v47 = vpop.permute.xlu0 %411  ;;  %v260_v48 = vld [vmem:[#allocation2 + $0x20] sm:$0xff] }
  0xc5   :  { %418 = vst.msk [vmem:[#allocation2 + $0x8] sm:$0xff] %vm81_vm3, %v414_v45  ;;  %417 = vst.msk [vmem:[#allocation2] sm:$0xff] %vm81_vm3, %v412_v47  ;;  %v1186_v49 = vpack.c.bf16 %v261_v46, %v260_v48 }
  0xc6   :  { %492 = vst.msk [vmem:[#allocation2 + $0x28] sm:$0xff] %vm49_vm0, %v490_v43  ;;  %491 = vst.msk [vmem:[#allocation2 + $0x20] sm:$0xff] %vm49_vm0, %v489_v44 }
  0xc7   :  { %1188 = vmatpush3.bf16.xpose.msk.msra.mxu0 %vm1524_vm6, %v1186_v49 }
  0xc8   :  { %v429_v50 = vpop.permute.xlu1 %428  ;;  %v427_v51 = vpop.permute.xlu0 %426  ;;  %1189 = vmatprep.subr.bf16.mxu0 %v1279_v12 }
  0xc9   :  { %433 = vst.msk [vmem:[#allocation2 + $0x8] sm:$0xff] %vm97_vm4, %v429_v50  ;;  %432 = vst.msk [vmem:[#allocation2] sm:$0xff] %vm97_vm4, %v427_v51 }
  0xcc   :  { %v221_v53 = vpop.permute.xlu1 %220  ;;  %v219_v54 = vpop.permute.xlu0 %218 }
  0xcd   :  { %225 = vst.msk [vmem:[#allocation2 + $0x38] sm:$0xff] %vm65_vm2, %v221_v53  ;;  %224 = vst.msk [vmem:[#allocation2 + $0x30] sm:$0xff] %vm65_vm2, %v219_v54 }
  0xd0   :  { %v236_v57 = vpop.permute.xlu1 %235  ;;  %v591_v58 = vld [vmem:[#allocation2 + $0x8] sm:$0xff]  ;;  %v234_v59 = vpop.permute.xlu0 %233  ;;  %v590_v60 = vld [vmem:[#allocation2] sm:$0xff] }
  0xd1   :  { %240 = vst.msk [vmem:[#allocation2 + $0x38] sm:$0xff] %vm81_vm3, %v236_v57  ;;  %239 = vst.msk [vmem:[#allocation2 + $0x30] sm:$0xff] %vm81_vm3, %v234_v59  ;;  %v1194_v61 = vpack.c.bf16 %v591_v58, %v590_v60  ;;  %v858_v59 = vstv %s1080_s24 }
  0xd2   :  { %706 = vst.msk [vmem:[#allocation2 + $0x8] sm:$0xff] %vm49_vm0, %v704_v55  ;;  %705 = vst.msk [vmem:[#allocation2] sm:$0xff] %vm49_vm0, %v703_v56 }
  0xd3   :  { %1196 = vmatpush3.bf16.xpose.msk.msra.mxu1 %vm1524_vm6, %v1194_v61 }
  0xd4   :  { %v251_v62 = vpop.permute.xlu1 %250  ;;  %v249_v63 = vpop.permute.xlu0 %248  ;;  %1197 = vmatprep.subr.bf16.mxu1 %v1279_v12 }
  0xd5   :  { %255 = vst.msk [vmem:[#allocation2 + $0x38] sm:$0xff] %vm97_vm4, %v251_v62  ;;  %254 = vst.msk [vmem:[#allocation2 + $0x30] sm:$0xff] %vm97_vm4, %v249_v63  ;;  %v860_v62 = vmul.f32 %v858_v59, %v1423_v7  ;;  %v859_v63 = vmul.f32 %v858_v59, %v1425_v9 }
  0xd8   :  { %v451_v3 = vpop.permute.xlu1 %450  ;;  %v449_v1 = vpop.permute.xlu0 %448 }
  0xd9   :  { %455 = vst.msk [vmem:[#allocation2 + $0x18] sm:$0xff] %vm65_vm2, %v451_v3  ;;  %454 = vst.msk [vmem:[#allocation2 + $0x10] sm:$0xff] %vm65_vm2, %v449_v1 }
  0xdc   :  { %v466_v5 = vpop.permute.xlu1 %465  ;;  %v263_v6 = vld [vmem:[#allocation2 + $0x38] sm:$0xff]  ;;  %v464_v8 = vpop.permute.xlu0 %463  ;;  %v262_v10 = vld [vmem:[#allocation2 + $0x30] sm:$0xff] }
  0xdd   :  { %470 = vst.msk [vmem:[#allocation2 + $0x18] sm:$0xff] %vm81_vm3, %v466_v5  ;;  %469 = vst.msk [vmem:[#allocation2 + $0x10] sm:$0xff] %vm81_vm3, %v464_v8  ;;  %v1190_v11 = vpack.c.bf16 %v263_v6, %v262_v10 }
  0xde   :  { %544 = vst.msk [vmem:[#allocation2 + $0x38] sm:$0xff] %vm49_vm0, %v542_v0  ;;  %543 = vst.msk [vmem:[#allocation2 + $0x30] sm:$0xff] %vm49_vm0, %v541_v4 }
  0xdf   :  { %1192 = vmatpush3.bf16.xpose.msk.msra.mxu0 %vm1524_vm6, %v1190_v11 }
  0xe0   :  { %v481_v39 = vpop.permute.xlu1 %480  ;;  %v479_v41 = vpop.permute.xlu0 %478  ;;  %1209 = vmatprep.subr.bf16.mxu0 %v1279_v12 }
  0xe1   :  { %485 = vst.msk [vmem:[#allocation2 + $0x18] sm:$0xff] %vm97_vm4, %v481_v39  ;;  %484 = vst.msk [vmem:[#allocation2 + $0x10] sm:$0xff] %vm97_vm4, %v479_v41 }
  0xe4   :  { %v717_v14 = vpop.permute.xlu1 %716  ;;  %v715_v17 = vpop.permute.xlu0 %714 }
  0xe5   :  { %721 = vst.msk [vmem:[#allocation2 + $0x8] sm:$0xff] %vm65_vm2, %v717_v14  ;;  %720 = vst.msk [vmem:[#allocation2] sm:$0xff] %vm65_vm2, %v715_v17 }
  0xe6   :  { %1137 = vmatmul.mubr.msk.f32.vlgmr.msra.gmra.mrb[0].mxu0 %vm264_vm5, %v1603_v15 }
  0xe7   :  { %1174 = vmatprep.mubr.msk.f32.mxu0 %vm1281_vm1, %v1282_v20 }
  0xe8   :  { %v732_v21 = vpop.permute.xlu1 %731  ;;  %v593_v22 = vld [vmem:[#allocation2 + $0x18] sm:$0xff]  ;;  %v730_v23 = vpop.permute.xlu0 %729  ;;  %v592_v24 = vld [vmem:[#allocation2 + $0x10] sm:$0xff] }
  0xe9   :  { %736 = vst.msk [vmem:[#allocation2 + $0x8] sm:$0xff] %vm81_vm3, %v732_v21  ;;  %735 = vst.msk [vmem:[#allocation2] sm:$0xff] %vm81_vm3, %v730_v23  ;;  %v1198_v25 = vpack.c.bf16 %v593_v22, %v592_v24 }
  0xea   :  { %758 = vst.msk [vmem:[#allocation2 + $0x18] sm:$0xff] %vm49_vm0, %v756_v18  ;;  %757 = vst.msk [vmem:[#allocation2 + $0x10] sm:$0xff] %vm49_vm0, %v755_v19 }
  0xeb   :  { %1200 = vmatpush3.bf16.xpose.msk.msra.mxu1 %vm1524_vm6, %v1198_v25 }
  0xec   :  { %v747_v26 = vpop.permute.xlu1 %746  ;;  %v745_v27 = vpop.permute.xlu0 %744  ;;  %1201 = vmatprep.subr.bf16.mxu1 %v1279_v12 }
  0xed   :  { %751 = vst.msk [vmem:[#allocation2 + $0x8] sm:$0xff] %vm97_vm4, %v747_v26  ;;  %750 = vst.msk [vmem:[#allocation2] sm:$0xff] %vm97_vm4, %v745_v27 }
  0xf0   :  { %v503_v20 = vpop.permute.xlu1 %502  ;;  %v501_v28 = vpop.permute.xlu0 %500 }
  0xf1   :  { %507 = vst.msk [vmem:[#allocation2 + $0x28] sm:$0xff] %vm65_vm2, %v503_v20  ;;  %506 = vst.msk [vmem:[#allocation2 + $0x20] sm:$0xff] %vm65_vm2, %v501_v28 }
  0xf4   :  { %v518_v29 = vpop.permute.xlu1 %517  ;;  %v909_v30 = vld [vmem:[#allocation2 + $0x8] sm:$0xff]  ;;  %v516_v31 = vpop.permute.xlu0 %515  ;;  %v908_v32 = vld [vmem:[#allocation2] sm:$0xff] }
  0xf5   :  { %522 = vst.msk [vmem:[#allocation2 + $0x28] sm:$0xff] %vm81_vm3, %v518_v29  ;;  %521 = vst.msk [vmem:[#allocation2 + $0x20] sm:$0xff] %vm81_vm3, %v516_v31  ;;  %v1210_v33 = vpack.c.bf16 %v909_v30, %v908_v32 }
  0xf7   :  { %1212 = vmatpush3.bf16.xpose.msk.msra.mxu0 %vm1524_vm6, %v1210_v33 }
  0xf8   :  { %v533_v34 = vpop.permute.xlu1 %532  ;;  %v531_v35 = vpop.permute.xlu0 %530  ;;  %1213 = vmatprep.subr.bf16.mxu0 %v1279_v12 }
  0xf9   :  { %537 = vst.msk [vmem:[#allocation2 + $0x28] sm:$0xff] %vm97_vm4, %v533_v34  ;;  %536 = vst.msk [vmem:[#allocation2 + $0x20] sm:$0xff] %vm97_vm4, %v531_v35 }
  0xfc   :  { %v769_v37 = vpop.permute.xlu1 %768  ;;  %v767_v38 = vpop.permute.xlu0 %766 }
  0xfd   :  { %773 = vst.msk [vmem:[#allocation2 + $0x18] sm:$0xff] %vm65_vm2, %v769_v37  ;;  %772 = vst.msk [vmem:[#allocation2 + $0x10] sm:$0xff] %vm65_vm2, %v767_v38 }
 0x100   :  { %v784_v43 = vpop.permute.xlu1 %783  ;;  %v595_v44 = vld [vmem:[#allocation2 + $0x28] sm:$0xff]  ;;  %v782_v45 = vpop.permute.xlu0 %781  ;;  %v594_v46 = vld [vmem:[#allocation2 + $0x20] sm:$0xff] }
 0x101   :  { %788 = vst.msk [vmem:[#allocation2 + $0x18] sm:$0xff] %vm81_vm3, %v784_v43  ;;  %787 = vst.msk [vmem:[#allocation2 + $0x10] sm:$0xff] %vm81_vm3, %v782_v45  ;;  %v1202_v47 = vpack.c.bf16 %v595_v44, %v594_v46 }
 0x102   :  { %810 = vst.msk [vmem:[#allocation2 + $0x28] sm:$0xff] %vm49_vm0, %v808_v40  ;;  %809 = vst.msk [vmem:[#allocation2 + $0x20] sm:$0xff] %vm49_vm0, %v807_v42 }
 0x103   :  { %1204 = vmatpush3.bf16.xpose.msk.msra.mxu1 %vm1524_vm6, %v1202_v47 }
 0x104   :  { %v799_v48 = vpop.permute.xlu1 %798  ;;  %v797_v49 = vpop.permute.xlu0 %796  ;;  %1205 = vmatprep.subr.bf16.mxu1 %v1279_v12 }
 0x105   :  { %803 = vst.msk [vmem:[#allocation2 + $0x18] sm:$0xff] %vm97_vm4, %v799_v48  ;;  %802 = vst.msk [vmem:[#allocation2 + $0x10] sm:$0xff] %vm97_vm4, %v797_v49 }
 0x108   :  { %v555_v50 = vpop.permute.xlu1 %554  ;;  %v553_v51 = vpop.permute.xlu0 %552 }
 0x109   :  { %559 = vst.msk [vmem:[#allocation2 + $0x38] sm:$0xff] %vm65_vm2, %v555_v50  ;;  %558 = vst.msk [vmem:[#allocation2 + $0x30] sm:$0xff] %vm65_vm2, %v553_v51 }
 0x10c   :  { %v570_v52 = vpop.permute.xlu1 %569  ;;  %v911_v53 = vld [vmem:[#allocation2 + $0x18] sm:$0xff]  ;;  %v568_v54 = vpop.permute.xlu0 %567  ;;  %v910_v55 = vld [vmem:[#allocation2 + $0x10] sm:$0xff] }
 0x10d   :  { %574 = vst.msk [vmem:[#allocation2 + $0x38] sm:$0xff] %vm81_vm3, %v570_v52  ;;  %573 = vst.msk [vmem:[#allocation2 + $0x30] sm:$0xff] %vm81_vm3, %v568_v54  ;;  %v1214_v56 = vpack.c.bf16 %v911_v53, %v910_v55 }
 0x10f   :  { %1216 = vmatpush3.bf16.xpose.msk.msra.mxu0 %vm1524_vm6, %v1214_v56 }
 0x110   :  { %v585_v57 = vpop.permute.xlu1 %584  ;;  %v583_v58 = vpop.permute.xlu0 %582  ;;  %1217 = vmatprep.subr.bf16.mxu0 %v1279_v12 }
 0x111   :  { %589 = vst.msk [vmem:[#allocation2 + $0x38] sm:$0xff] %vm97_vm4, %v585_v57  ;;  %588 = vst.msk [vmem:[#allocation2 + $0x30] sm:$0xff] %vm97_vm4, %v583_v58 }
 0x114   :  { %v821_v60 = vpop.permute.xlu1 %820  ;;  %v819_v61 = vpop.permute.xlu0 %818 }
 0x115   :  { %825 = vst.msk [vmem:[#allocation2 + $0x28] sm:$0xff] %vm65_vm2, %v821_v60  ;;  %824 = vst.msk [vmem:[#allocation2 + $0x20] sm:$0xff] %vm65_vm2, %v819_v61 }
 0x118   :  { %v836_v2 = vpop.permute.xlu1 %835  ;;  %v597_v3 = vld [vmem:[#allocation2 + $0x38] sm:$0xff]  ;;  %v834_v1 = vpop.permute.xlu0 %833  ;;  %v596_v0 = vld [vmem:[#allocation2 + $0x30] sm:$0xff] }
 0x119   :  { %840 = vst.msk [vmem:[#allocation2 + $0x28] sm:$0xff] %vm81_vm3, %v836_v2  ;;  %839 = vst.msk [vmem:[#allocation2 + $0x20] sm:$0xff] %vm81_vm3, %v834_v1  ;;  %v1206_v4 = vpack.c.bf16 %v597_v3, %v596_v0 }
 0x11a   :  { %862 = vst.msk [vmem:[#allocation2 + $0x38] sm:$0xff] %vm49_vm0, %v860_v62  ;;  %861 = vst.msk [vmem:[#allocation2 + $0x30] sm:$0xff] %vm49_vm0, %v859_v63 }
 0x11b   :  { %1208 = vmatpush3.bf16.xpose.msk.msra.mxu1 %vm1524_vm6, %v1206_v4 }
 0x11c   :  { %v851_v7 = vpop.permute.xlu1 %850  ;;  %v849_v9 = vpop.permute.xlu0 %848 }
 0x11d   :  { %855 = vst.msk [vmem:[#allocation2 + $0x28] sm:$0xff] %vm97_vm4, %v851_v7  ;;  %854 = vst.msk [vmem:[#allocation2 + $0x20] sm:$0xff] %vm97_vm4, %v849_v9 }
 0x120   :  { %v873_v5 = vpop.permute.xlu1 %872  ;;  %v871_v6 = vpop.permute.xlu0 %870 }
 0x121   :  { %877 = vst.msk [vmem:[#allocation2 + $0x38] sm:$0xff] %vm65_vm2, %v873_v5  ;;  %876 = vst.msk [vmem:[#allocation2 + $0x30] sm:$0xff] %vm65_vm2, %v871_v6 }
 0x122   :  { %1156 = vmatmul.mubr.msk.f32.vlgmr.msra.gmra.mrb[0].mxu1 %vm264_vm5, %v1603_v15 }
 0x124   :  { %v888_v8 = vpop.permute.xlu1 %887  ;;  %v913_v10 = vld [vmem:[#allocation2 + $0x28] sm:$0xff]  ;;  %v886_v11 = vpop.permute.xlu0 %885  ;;  %v912_v39 = vld [vmem:[#allocation2 + $0x20] sm:$0xff] }
 0x125   :  { %892 = vst.msk [vmem:[#allocation2 + $0x38] sm:$0xff] %vm81_vm3, %v888_v8  ;;  %891 = vst.msk [vmem:[#allocation2 + $0x30] sm:$0xff] %vm81_vm3, %v886_v11  ;;  %v1218_v41 = vpack.c.bf16 %v913_v10, %v912_v39 }
 0x127   :  { %1220 = vmatpush3.bf16.xpose.msk.msra.mxu0 %vm1524_vm6, %v1218_v41 }
 0x128   :  { %v903_v13 = vpop.permute.xlu1 %902  ;;  %v901_v14 = vpop.permute.xlu0 %900  ;;  %1221 = vmatprep.subr.bf16.mxu0 %v1279_v12 }
 0x129   :  { %907 = vst.msk [vmem:[#allocation2 + $0x38] sm:$0xff] %vm97_vm4, %v903_v13  ;;  %906 = vst.msk [vmem:[#allocation2 + $0x30] sm:$0xff] %vm97_vm4, %v901_v14 }
 0x130   :  { %v915_v17 = vld [vmem:[#allocation2 + $0x38] sm:$0xff]  ;;  %v914_v18 = vld [vmem:[#allocation2 + $0x30] sm:$0xff] }
 0x131   :  { %v1222_v19 = vpack.c.bf16 %v915_v17, %v914_v18 }
 0x133   :  { %1224 = vmatpush3.bf16.xpose.msk.msra.mxu0 %vm1524_vm6, %v1222_v19 }
 0x13a   :  { %1175 = vmatmul.mubr.msk.f32.vlgmr.msra.gmra.mrb[2].mxu0 %vm264_vm5, %v1603_v15 }
 0x1b9   :  { %v358_v21 = vpop.f32.mrb[0].mxu0 }
 0x1ba   :  { %v366_v22 = vadd.f32 %v358_v21, %v1603_v15  ;;  %v1138_v23 = vpop.f32.mrb[1].mxu0 }
 0x1bc   :  { %368 = vst.msk [vmem:[%s1699_s3] sm:$0x3] %vm367_vm7, %v366_v22 }
 0x1c3   :  { %v692_v12 = vld [vmem:[%s1699_s3] sm:$0x3] }
 0x1f5   :  { %v688_v24 = vpop.f32.mrb[0].mxu1 }
 0x1f6   :  { %v693_v25 = vadd.f32 %v692_v12, %v688_v24  ;;  %v1157_v16 = vpop.f32.mrb[1].mxu1 }
 0x1f8   :  { %695 = vst.msk [vmem:[%s1699_s3] sm:$0x3] %vm367_vm7, %v693_v25 }
 0x1ff   :  { %v1010_v15 = vld [vmem:[%s1699_s3] sm:$0x3] }
 0x20d   :  { %v1006_v26 = vpop.f32.mrb[2].mxu0 }
 0x20e   :  { %v1011_v27 = vadd.f32 %v1010_v15, %v1006_v26  ;;  %v1176_v20 = vpop.f32.mrb[3].mxu0 }
 0x210   :  { %1012 = vst.msk [vmem:[%s1699_s3] sm:$0x3] %vm367_vm7, %v1011_v27 }
 0x211   :  { %1017 = vsyncpa [#allocation4], 1 }
 0x212   :  { %1018 = vsyncpa [#allocation5], 1 }

</bundles_post_ra>
